<compile_context>
chip_gen: v6e
topology: v6e:2x2x1
jax: 0.10.0
libtpu: 0.0.40
codegen_flags: <defaults>
</compile_context>

<pallas_src>
import numpy as np
import jax
import jax.numpy as jnp
from jax.experimental import pallas as pl
from jax.experimental.pallas import tpu as pltpu


# ----------------------------- Pallas kernel -----------------------------
def gau_kernel(xf_ref, k_ref, bsim_ref, zg_ref, wg_ref, bg_ref, fc_ref,
               wfie_ref, wfig_ref, bfi_ref, out_ref, sce_ref, scf_ref):
    f32, bf16 = jnp.float32, jnp.bfloat16
    xf = xf_ref[0]                                  # (NT, C) bf16 search tokens of this row-tile
    nt, c = xf.shape
    wx = fc_ref.shape[0]                            # search width
    rt = nt // wx                                   # h-rows in this tile
    nzp = k_ref.shape[-1] // 4                      # padded template tokens per head

    # All-head similarities in ONE wide MXU matmul; padded key columns carry -1e30 in the bias.
    sim_all = jnp.dot(xf, k_ref[0], preferred_element_type=f32) + bsim_ref[0]        # (NT, 4*NzP)

    # xf-side g heads: one fused (NT, C) @ (C, 4C) matmul (conv + BN folded), then the average.
    xg_all = jnp.maximum(jnp.dot(xf, wg_ref[...], preferred_element_type=f32) + bg_ref[...], 0.0)
    xg = (0.25 * (xg_all[:, :c] + xg_all[:, c:2 * c]
                  + xg_all[:, 2 * c:3 * c] + xg_all[:, 3 * c:])).astype(bf16)         # (NT, C)

    # Per-head softmax (lane-aligned 128-wide slices) + attention read of the template values.
    # Each head's (NT, C) embedding is scattered straight into the w-major (4Wx, RT*C) scratch
    # consumed by fc -- plain static slices + stores, no concatenate / value reshapes.
    for i in range(4):                               # static unroll over the 4 heads
        s = sim_all[:, i * nzp:(i + 1) * nzp]
        s = s - jnp.max(s, axis=-1, keepdims=True)
        p = jnp.exp(s)                               # padded cols -> exp(-1e30) == 0
        p = p * pl.reciprocal(jnp.sum(p, axis=-1, keepdims=True), approx=True)
        zg_i = zg_ref[0, i * nzp:(i + 1) * nzp, :]                                    # (NzP, C)
        emb_i = jnp.dot(p.astype(bf16), zg_i, preferred_element_type=f32).astype(bf16)  # (NT, C)
        for h in range(rt):                          # h/w transpose via slices + stores only
            sce_ref[i * wx:(i + 1) * wx, h * c:(h + 1) * c] = emb_i[h * wx:(h + 1) * wx, :]

    # self.fc as one long (Wx, 4Wx) @ (4Wx, RT*C) MXU matmul, then back to token-major for fi.
    fc_out = jnp.dot(fc_ref[...], sce_ref[...], preferred_element_type=f32).astype(bf16)  # (Wx, RT*C)
    for h in range(rt):
        scf_ref[h * wx:(h + 1) * wx, :] = fc_out[:, h * c:(h + 1) * c]

    # fi 1x1 conv (BN folded; weight split over the [embedding, xf_g] channel concat) + ReLU.
    out = (jnp.dot(scf_ref[...], wfie_ref[...], preferred_element_type=f32)
           + jnp.dot(xg, wfig_ref[...], preferred_element_type=f32)
           + bfi_ref[...])
    out_ref[0] = jnp.maximum(out, 0.0).astype(out_ref.dtype)


# ----------------------------- wrapper -----------------------------
def _pick_row_split(Hx, Wx):
    # fc only mixes width positions within one h-row, so row-aligned xf tiles are self-contained.
    # Smallest split >= 2 whose tile token count stays sublane (8) aligned; else no split.
    # TODO(synk): on v7x at batch=1 pad Hx so a >=2-way split always exists (2nd TensorCore).
    for n in range(2, Hx + 1):
        if Hx % n == 0 and ((Hx // n) * Wx) % 8 == 0:
            return n
    return 1


def graph_attention_union(zf_nchw, xf_nchw, params, out_channel):
    B, C, Hz, Wz = zf_nchw.shape
    _, _, Hx, Wx = xf_nchw.shape
    Nz, Nx = Hz * Wz, Hx * Wx
    O = out_channel
    O_pad = -(-O // 128) * 128            # lane-dense output stores
    NzP = -(-Nz // 128) * 128             # per-head padded key count (lane-aligned head blocks)
    eps = 1e-5
    f32, bf16 = jnp.float32, jnp.bfloat16

    def fold(w, b, stats):                # fold eval-mode BN into the preceding 1x1 conv
        gamma, beta, mean, var = stats
        sc = gamma / jnp.sqrt(var + eps)
        return w * sc[:, None], (b - mean) * sc + beta

    # ---- zf-side path hoisted out of the kernel (grid-invariant; tiny, left to XLA) ----
    zf_tok = zf_nchw.reshape(B, C, Nz).transpose(0, 2, 1)                          # (B, Nz, C) f32
    zt0 = jnp.einsum('bmc,oc->bmo', zf_tok, params['ws'][0]) + params['bs'][0]     # support_0(zf)

    NEG = -1e30
    k_blk, b_blk, zg_blk, wg_cols, bg_cols = [], [], [], [], []
    for i in range(4):
        # query_i folded into the shared support_0 keys:
        #   sim_i = (xf @ Wq_i^T + bq_i) @ zt0^T = xf @ K_i + bias_i
        K_i = jnp.einsum('oc,bmo->bcm', params['wq'][i], zt0)                      # (B, C, Nz)
        bias_i = jnp.einsum('o,bmo->bm', params['bq'][i], zt0)                     # (B, Nz)
        wgf, bgf = fold(params['wg'][i], params['bg'][i], params['bn_g'][i])
        zg_i = jax.nn.relu(jnp.einsum('bmc,oc->bmo', zf_tok, wgf) + bgf)           # (B, Nz, C)
        k_blk.append(jnp.pad(K_i, ((0, 0), (0, 0), (0, NzP - Nz))))
        b_blk.append(jnp.pad(bias_i, ((0, 0), (0, NzP - Nz)), constant_values=NEG))
        zg_blk.append(jnp.pad(zg_i, ((0, 0), (0, NzP - Nz), (0, 0))))
        wg_cols.append(wgf.T)
        bg_cols.append(bgf)
    k_stk = jnp.concatenate(k_blk, axis=-1).astype(bf16)                           # (B, C, 4*NzP)
    bsim = jnp.concatenate(b_blk, axis=-1)[:, None, :].astype(f32)                 # (B, 1, 4*NzP)
    zg_stk = jnp.concatenate(zg_blk, axis=1).astype(bf16)                          # (B, 4*NzP, C)

    xf_tok = xf_nchw.reshape(B, C, Nx).transpose(0, 2, 1).astype(bf16)             # (B, Nx, C)

    wg_all = jnp.concatenate(wg_cols, axis=1).astype(bf16)                         # (C, 4C)
    bg_all = jnp.concatenate(bg_cols, axis=0)[None, :].astype(f32)                 # (1, 4C)

    wfi_f, bfi_f = fold(params['wfi'], params['bfi'], params['bn_fi'])
    wfi_e = jnp.pad(wfi_f[:, :C].T, ((0, 0), (0, O_pad - O))).astype(bf16)         # (C, O_pad)
    wfi_g = jnp.pad(wfi_f[:, C:].T, ((0, 0), (0, O_pad - O))).astype(bf16)         # (C, O_pad)
    bfi = jnp.pad(bfi_f, (0, O_pad - O))[None, :].astype(f32)                      # (1, O_pad)

    fc_w = params['fc_w'].astype(bf16)                                             # (Wx, 4Wx) 2-D

    n_row_tiles = _pick_row_split(Hx, Wx)
    RT = Hx // n_row_tiles                # h-rows per tile
    NT = RT * Wx                          # search tokens per tile

    weights = (wg_all, bg_all, fc_w, wfi_e, wfi_g, bfi)

    def rep(arr):                         # grid-invariant, full-array block
        # TODO(synk): pipeline_mode=pl.Buffered(1) to single-buffer these once supported.
        return pl.BlockSpec(arr.shape, lambda b, i, _nd=arr.ndim: (0,) * _nd)

    # VMEM budget: double-buffered blocks + f32 temporaries, capped below physical per-core VMEM.
    blk_in = NT * C * 2 + C * 4 * NzP * 2 + 4 * NzP * 4 + 4 * NzP * C * 2
    blk_w = sum(int(a.size) * a.dtype.itemsize for a in weights)
    blk_out = NT * O_pad * 2
    tmp = 4 * (NT * 4 * NzP + 2 * NT * 4 * C + 4 * NT * C + NT * O_pad) \
        + 2 * (4 * Wx * RT * C + NT * C)
    need = 2 * (blk_in + blk_w + blk_out) + 2 * tmp
    cap = 128 << 20
    try:
        cap = int(getattr(pltpu.get_tpu_info(), 'vmem_capacity_bytes', cap))
    except Exception:
        pass
    vmem_limit = int(min(max(need + (8 << 20), 32 << 20),
                         max(int(0.75 * cap), need + (8 << 20))))

    out_tok = pl.pallas_call(
        gau_kernel,
        out_shape=jax.ShapeDtypeStruct((B, Nx, O_pad), bf16),
        grid_spec=pltpu.PrefetchScalarGridSpec(
            num_scalar_prefetch=0,
            grid=(B, n_row_tiles),
            in_specs=[
                pl.BlockSpec((1, NT, C), lambda b, i: (b, i, 0)),        # xf row-tile
                pl.BlockSpec((1, C, 4 * NzP), lambda b, i: (b, 0, 0)),   # stacked head keys
                pl.BlockSpec((1, 1, 4 * NzP), lambda b, i: (b, 0, 0)),   # key bias + pad mask
                pl.BlockSpec((1, 4 * NzP, C), lambda b, i: (b, 0, 0)),   # stacked zf_g values
                rep(wg_all), rep(bg_all),                                # g heads (fused, folded)
                rep(fc_w),                                               # fc weight (2-D)
                rep(wfi_e), rep(wfi_g), rep(bfi),                        # fi (folded, split)
            ],
            out_specs=pl.BlockSpec((1, NT, O_pad), lambda b, i: (b, i, 0)),
            scratch_shapes=[pltpu.VMEM((4 * Wx, RT * C), bf16),          # w-major emb for fc
                            pltpu.VMEM((NT, C), bf16)],                  # token-major emb_fc
        ),
        compiler_params=pltpu.CompilerParams(
            dimension_semantics=("parallel", "parallel"),
            vmem_limit_bytes=vmem_limit),
    )(xf_tok, k_stk, bsim, zg_stk, *weights)

    return out_tok[:, :, :O].astype(f32).transpose(0, 2, 1).reshape(B, O, Hx, Wx)


# ------------------- pure-JAX reference (mirrors the torch code, f32) -------------------
def torch_reference(zf, xf, params, out_channel):
    eps = 1e-5

    def conv1x1(x, w, b):
        return jnp.einsum('bchw,oc->bohw', x, w) + b[None, :, None, None]

    def bn(x, stats):
        gamma, beta, mean, var = stats
        sc = (gamma / jnp.sqrt(var + eps))[None, :, None, None]
        return (x - mean[None, :, None, None]) * sc + beta[None, :, None, None]

    def g(x, i):
        return jax.nn.relu(bn(conv1x1(x, params['wg'][i], params['bg'][i]), params['bn_g'][i]))

    B, C, Hx, Wx = xf.shape
    _, _, Hz, Wz = zf.shape
    Nz, Nx = Hz * Wz, Hx * Wx

    xf_trans = [conv1x1(xf, params['wq'][i], params['bq'][i]) for i in range(4)]
    zf_trans_0 = conv1x1(zf, params['ws'][0], params['bs'][0])
    xf_g = sum(g(xf, i) for i in range(4)) / 4
    zf_g = [g(zf, i) for i in range(4)]

    zt0_plain = zf_trans_0.reshape(B, C, Nz)                                  # (B, C, Nz)
    zg_plain = [z.reshape(B, C, Nz).transpose(0, 2, 1) for z in zf_g]         # (B, Nz, C)
    xt_plain = [x.reshape(B, C, Nx).transpose(0, 2, 1) for x in xf_trans]     # (B, Nx, C)

    embs = []
    for i in range(4):
        sim = jnp.einsum('bnc,bcm->bnm', xt_plain[i], zt0_plain)              # zf_trans_0 for all heads
        sim = jax.nn.softmax(sim, axis=2)
        e = jnp.einsum('bnm,bmc->bnc', sim, zg_plain[i]).transpose(0, 2, 1)
        embs.append(e.reshape(B, C, Hx, Wx))
    embedding = jnp.concatenate(embs, axis=-1)                                # (B, C, Hx, 4*Wx)
    embedding = jnp.einsum('bchw,vw->bchv', embedding, params['fc_w'])        # fc (no bias)
    output = jnp.concatenate([embedding, xf_g], axis=1)
    output = jax.nn.relu(bn(conv1x1(output, params['wfi'], params['bfi']), params['bn_fi']))
    return output


# ----------------------------- deterministic parameter init -----------------------------
def init_params(key, C, O, Wx):
    keys = iter(jax.random.split(key, 64))

    def nrm(shape, scale=0.05):
        return scale * jax.random.normal(next(keys), shape, jnp.float32)

    def bn_stats(n):
        return (1.0 + nrm((n,)),                                  # gamma
                nrm((n,)),                                        # beta
                nrm((n,)),                                        # running_mean
                1.0 + 0.1 * jnp.abs(jax.random.normal(next(keys), (n,), jnp.float32)))  # running_var

    return {
        'wq': [nrm((C, C)) for _ in range(4)],
        'bq': [nrm((C,)) for _ in range(4)],
        'ws': [nrm((C, C))],
        'bs': [nrm((C,))],
        'wg': [nrm((C, C)) for _ in range(4)],
        'bg': [nrm((C,)) for _ in range(4)],
        'bn_g': [bn_stats(C) for _ in range(4)],
        'wfi': nrm((O, 2 * C)),
        'bfi': nrm((O,)),
        'bn_fi': bn_stats(O),
        'fc_w': nrm((Wx, 4 * Wx)),     # generic form of Linear(625*4, 625, bias=False)
    }


if __name__ == "__main__":
    B, C, O = 2, 64, 48
    Hz = Wz = 4      # template (zf) spatial
    Hx = Wx = 8      # search (xf) spatial

    key = jax.random.PRNGKey(0)
    kz, kx, kp = jax.random.split(key, 3)
    zf = jax.random.normal(kz, (B, C, Hz, Wz), jnp.float32)
    xf = jax.random.normal(kx, (B, C, Hx, Wx), jnp.float32)
    params = init_params(kp, C, O, Wx)

    out = graph_attention_union(zf, xf, params, O)
    out = jax.block_until_ready(out)

    ref = torch_reference(zf, xf, params, O)
    # bf16 MXU matmuls (f32 accumulation) + bf16 output vs the f32 reference -> loose tolerance.
    np.testing.assert_allclose(np.asarray(out), np.asarray(ref), rtol=5e-2, atol=5e-2)
    print("KERNEL_OK")
</pallas_src>

<mosaic_0001>
module attributes {stable_mosaic.version = 11 : i64} {
  func.func @gau_kernel(%arg0: i32, %arg1: i32, %arg2: memref<1x32x64xbf16, #tpu.memory_space<vmem>>, %arg3: memref<1x64x512xbf16, #tpu.memory_space<vmem>>, %arg4: memref<1x1x512xf32, #tpu.memory_space<vmem>>, %arg5: memref<1x512x64xbf16, #tpu.memory_space<vmem>>, %arg6: memref<64x256xbf16, #tpu.memory_space<vmem>>, %arg7: memref<1x256xf32, #tpu.memory_space<vmem>>, %arg8: memref<8x32xbf16, #tpu.memory_space<vmem>>, %arg9: memref<64x128xbf16, #tpu.memory_space<vmem>>, %arg10: memref<64x128xbf16, #tpu.memory_space<vmem>>, %arg11: memref<1x128xf32, #tpu.memory_space<vmem>>, %arg12: memref<1x32x128xbf16, #tpu.memory_space<vmem>>, %arg13: memref<32x256xbf16, #tpu.memory_space<vmem>>, %arg14: memref<32x64xbf16, #tpu.memory_space<vmem>>) attributes {dimension_semantics = [#tpu.dimension_semantics<parallel>, #tpu.dimension_semantics<parallel>], iteration_bounds = array<i64: 2, 2>, scalar_prefetch = 0 : i64, scratch_operands = 2 : i64, tpu.core_type = #tpu.core_type<tc>, window_params = [{transform_indices = @transform_0, window_bounds = array<i64: 1, 32, 64>}, {transform_indices = @transform_1, window_bounds = array<i64: 1, 64, 512>}, {transform_indices = @transform_2, window_bounds = array<i64: 1, 1, 512>}, {transform_indices = @transform_3, window_bounds = array<i64: 1, 512, 64>}, {pipeline_mode = #tpu.pipeline_mode<synchronous>, transform_indices = @transform_4, window_bounds = array<i64: 64, 256>}, {pipeline_mode = #tpu.pipeline_mode<synchronous>, transform_indices = @transform_5, window_bounds = array<i64: 1, 256>}, {pipeline_mode = #tpu.pipeline_mode<synchronous>, transform_indices = @transform_6, window_bounds = array<i64: 8, 32>}, {pipeline_mode = #tpu.pipeline_mode<synchronous>, transform_indices = @transform_7, window_bounds = array<i64: 64, 128>}, {pipeline_mode = #tpu.pipeline_mode<synchronous>, transform_indices = @transform_8, window_bounds = array<i64: 64, 128>}, {pipeline_mode = #tpu.pipeline_mode<synchronous>, transform_indices = @transform_9, window_bounds = array<i64: 1, 128>}, {transform_indices = @transform_10, window_bounds = array<i64: 1, 32, 128>}]} {
    %c0 = arith.constant 0 : index
    %c0_0 = arith.constant 0 : index
    %c0_1 = arith.constant 0 : index
    %0 = vector.load %arg2[%c0, %c0_0, %c0_1] : memref<1x32x64xbf16, #tpu.memory_space<vmem>>, vector<1x32x64xbf16>
    %1 = vector.shape_cast %0 : vector<1x32x64xbf16> to vector<32x64xbf16>
    %c0_2 = arith.constant 0 : index
    %c0_3 = arith.constant 0 : index
    %c0_4 = arith.constant 0 : index
    %2 = vector.load %arg3[%c0_2, %c0_3, %c0_4] : memref<1x64x512xbf16, #tpu.memory_space<vmem>>, vector<1x64x512xbf16>
    %3 = vector.shape_cast %2 : vector<1x64x512xbf16> to vector<64x512xbf16>
    %cst = arith.constant dense<0.000000e+00> : vector<32x512xf32>
    %4 = tpu.matmul %1, %3, %cst {dimension_numbers = #tpu.dot_dimension_numbers<[1], [0], [0], [1], [0, 0, 1, 1], [], []>} : vector<32x64xbf16>, vector<64x512xbf16>, vector<32x512xf32> -> vector<32x512xf32>
    %c0_5 = arith.constant 0 : index
    %c0_6 = arith.constant 0 : index
    %c0_7 = arith.constant 0 : index
    %5 = vector.load %arg4[%c0_5, %c0_6, %c0_7] : memref<1x1x512xf32, #tpu.memory_space<vmem>>, vector<1x1x512xf32>
    %6 = vector.shape_cast %5 : vector<1x1x512xf32> to vector<1x512xf32>
    %7 = vector.broadcast %6 : vector<1x512xf32> to vector<32x512xf32>
    %8 = arith.addf %4, %7 : vector<32x512xf32>
    %c0_8 = arith.constant 0 : index
    %c0_9 = arith.constant 0 : index
    %9 = vector.load %arg6[%c0_8, %c0_9] : memref<64x256xbf16, #tpu.memory_space<vmem>>, vector<64x256xbf16>
    %cst_10 = arith.constant dense<0.000000e+00> : vector<32x256xf32>
    %10 = tpu.matmul %1, %9, %cst_10 {dimension_numbers = #tpu.dot_dimension_numbers<[1], [0], [0], [1], [0, 0, 1, 1], [], []>} : vector<32x64xbf16>, vector<64x256xbf16>, vector<32x256xf32> -> vector<32x256xf32>
    %c0_11 = arith.constant 0 : index
    %c0_12 = arith.constant 0 : index
    %11 = vector.load %arg7[%c0_11, %c0_12] : memref<1x256xf32, #tpu.memory_space<vmem>>, vector<1x256xf32>
    %12 = vector.broadcast %11 : vector<1x256xf32> to vector<32x256xf32>
    %13 = arith.addf %10, %12 : vector<32x256xf32>
    %cst_13 = arith.constant 0.000000e+00 : f32
    %14 = vector.broadcast %cst_13 : f32 to vector<32x256xf32>
    %15 = arith.maximumf %13, %14 : vector<32x256xf32>
    %16 = vector.extract_strided_slice %15 {offsets = [0, 0], sizes = [32, 64], strides = [1, 1]} : vector<32x256xf32> to vector<32x64xf32>
    %17 = vector.extract_strided_slice %15 {offsets = [0, 64], sizes = [32, 64], strides = [1, 1]} : vector<32x256xf32> to vector<32x64xf32>
    %18 = arith.addf %16, %17 : vector<32x64xf32>
    %19 = vector.extract_strided_slice %15 {offsets = [0, 128], sizes = [32, 64], strides = [1, 1]} : vector<32x256xf32> to vector<32x64xf32>
    %20 = arith.addf %18, %19 : vector<32x64xf32>
    %21 = vector.extract_strided_slice %15 {offsets = [0, 192], sizes = [32, 64], strides = [1, 1]} : vector<32x256xf32> to vector<32x64xf32>
    %22 = arith.addf %20, %21 : vector<32x64xf32>
    %cst_14 = arith.constant 2.500000e-01 : f32
    %23 = vector.broadcast %cst_14 : f32 to vector<32x64xf32>
    %24 = arith.mulf %23, %22 : vector<32x64xf32>
    %25 = arith.truncf %24 : vector<32x64xf32> to vector<32x64xbf16>
    %26 = vector.extract_strided_slice %8 {offsets = [0, 0], sizes = [32, 128], strides = [1, 1]} : vector<32x512xf32> to vector<32x128xf32>
    %cst_15 = arith.constant dense<0xFF800000> : vector<32xf32>
    %27 = vector.multi_reduction <maximumf>, %26, %cst_15 [1] : vector<32x128xf32> to vector<32xf32>
    %28 = vector.shape_cast %27 : vector<32xf32> to vector<32x1xf32>
    %29 = vector.broadcast %28 : vector<32x1xf32> to vector<32x128xf32>
    %30 = arith.subf %26, %29 : vector<32x128xf32>
    %31 = math.exp %30 : vector<32x128xf32>
    %cst_16 = arith.constant dense<0.000000e+00> : vector<32xf32>
    %32 = vector.multi_reduction <add>, %31, %cst_16 [1] : vector<32x128xf32> to vector<32xf32>
    %33 = vector.shape_cast %32 : vector<32xf32> to vector<32x1xf32>
    %34 = tpu.reciprocal %33 {approx = true} : vector<32x1xf32> -> vector<32x1xf32>
    %35 = vector.broadcast %34 : vector<32x1xf32> to vector<32x128xf32>
    %36 = arith.mulf %31, %35 : vector<32x128xf32>
    %c0_17 = arith.constant 0 : index
    %c0_18 = arith.constant 0 : index
    %c0_19 = arith.constant 0 : index
    %37 = vector.load %arg5[%c0_17, %c0_18, %c0_19] : memref<1x512x64xbf16, #tpu.memory_space<vmem>>, vector<1x128x64xbf16>
    %38 = vector.shape_cast %37 : vector<1x128x64xbf16> to vector<128x64xbf16>
    %39 = arith.truncf %36 : vector<32x128xf32> to vector<32x128xbf16>
    %cst_20 = arith.constant dense<0.000000e+00> : vector<32x64xf32>
    %40 = tpu.matmul %39, %38, %cst_20 {dimension_numbers = #tpu.dot_dimension_numbers<[1], [0], [0], [1], [0, 0, 1, 1], [], []>} : vector<32x128xbf16>, vector<128x64xbf16>, vector<32x64xf32> -> vector<32x64xf32>
    %41 = arith.truncf %40 : vector<32x64xf32> to vector<32x64xbf16>
    %42 = vector.extract_strided_slice %41 {offsets = [0, 0], sizes = [8, 64], strides = [1, 1]} : vector<32x64xbf16> to vector<8x64xbf16>
    %c0_21 = arith.constant 0 : index
    %c0_22 = arith.constant 0 : index
    %43 = vector.load %arg13[%c0_21, %c0_22] : memref<32x256xbf16, #tpu.memory_space<vmem>>, vector<8x64xbf16>
    tpu.vector_store %arg13[%c0_21, %c0_22], %42 {strides = array<i32>} : memref<32x256xbf16, #tpu.memory_space<vmem>>, vector<8x64xbf16>,
    %44 = vector.extract_strided_slice %41 {offsets = [8, 0], sizes = [8, 64], strides = [1, 1]} : vector<32x64xbf16> to vector<8x64xbf16>
    %c0_23 = arith.constant 0 : index
    %c64 = arith.constant 64 : index
    %45 = vector.load %arg13[%c0_23, %c64] : memref<32x256xbf16, #tpu.memory_space<vmem>>, vector<8x64xbf16>
    tpu.vector_store %arg13[%c0_23, %c64], %44 {strides = array<i32>} : memref<32x256xbf16, #tpu.memory_space<vmem>>, vector<8x64xbf16>,
    %46 = vector.extract_strided_slice %41 {offsets = [16, 0], sizes = [8, 64], strides = [1, 1]} : vector<32x64xbf16> to vector<8x64xbf16>
    %c0_24 = arith.constant 0 : index
    %c128 = arith.constant 128 : index
    %47 = vector.load %arg13[%c0_24, %c128] : memref<32x256xbf16, #tpu.memory_space<vmem>>, vector<8x64xbf16>
    tpu.vector_store %arg13[%c0_24, %c128], %46 {strides = array<i32>} : memref<32x256xbf16, #tpu.memory_space<vmem>>, vector<8x64xbf16>,
    %48 = vector.extract_strided_slice %41 {offsets = [24, 0], sizes = [8, 64], strides = [1, 1]} : vector<32x64xbf16> to vector<8x64xbf16>
    %c0_25 = arith.constant 0 : index
    %c192 = arith.constant 192 : index
    %49 = vector.load %arg13[%c0_25, %c192] : memref<32x256xbf16, #tpu.memory_space<vmem>>, vector<8x64xbf16>
    tpu.vector_store %arg13[%c0_25, %c192], %48 {strides = array<i32>} : memref<32x256xbf16, #tpu.memory_space<vmem>>, vector<8x64xbf16>,
    %50 = vector.extract_strided_slice %8 {offsets = [0, 128], sizes = [32, 128], strides = [1, 1]} : vector<32x512xf32> to vector<32x128xf32>
    %cst_26 = arith.constant dense<0xFF800000> : vector<32xf32>
    %51 = vector.multi_reduction <maximumf>, %50, %cst_26 [1] : vector<32x128xf32> to vector<32xf32>
    %52 = vector.shape_cast %51 : vector<32xf32> to vector<32x1xf32>
    %53 = vector.broadcast %52 : vector<32x1xf32> to vector<32x128xf32>
    %54 = arith.subf %50, %53 : vector<32x128xf32>
    %55 = math.exp %54 : vector<32x128xf32>
    %cst_27 = arith.constant dense<0.000000e+00> : vector<32xf32>
    %56 = vector.multi_reduction <add>, %55, %cst_27 [1] : vector<32x128xf32> to vector<32xf32>
    %57 = vector.shape_cast %56 : vector<32xf32> to vector<32x1xf32>
    %58 = tpu.reciprocal %57 {approx = true} : vector<32x1xf32> -> vector<32x1xf32>
    %59 = vector.broadcast %58 : vector<32x1xf32> to vector<32x128xf32>
    %60 = arith.mulf %55, %59 : vector<32x128xf32>
    %c0_28 = arith.constant 0 : index
    %c128_29 = arith.constant 128 : index
    %c0_30 = arith.constant 0 : index
    %61 = vector.load %arg5[%c0_28, %c128_29, %c0_30] : memref<1x512x64xbf16, #tpu.memory_space<vmem>>, vector<1x128x64xbf16>
    %62 = vector.shape_cast %61 : vector<1x128x64xbf16> to vector<128x64xbf16>
    %63 = arith.truncf %60 : vector<32x128xf32> to vector<32x128xbf16>
    %cst_31 = arith.constant dense<0.000000e+00> : vector<32x64xf32>
    %64 = tpu.matmul %63, %62, %cst_31 {dimension_numbers = #tpu.dot_dimension_numbers<[1], [0], [0], [1], [0, 0, 1, 1], [], []>} : vector<32x128xbf16>, vector<128x64xbf16>, vector<32x64xf32> -> vector<32x64xf32>
    %65 = arith.truncf %64 : vector<32x64xf32> to vector<32x64xbf16>
    %66 = vector.extract_strided_slice %65 {offsets = [0, 0], sizes = [8, 64], strides = [1, 1]} : vector<32x64xbf16> to vector<8x64xbf16>
    %c8 = arith.constant 8 : index
    %c0_32 = arith.constant 0 : index
    %67 = vector.load %arg13[%c8, %c0_32] : memref<32x256xbf16, #tpu.memory_space<vmem>>, vector<8x64xbf16>
    tpu.vector_store %arg13[%c8, %c0_32], %66 {strides = array<i32>} : memref<32x256xbf16, #tpu.memory_space<vmem>>, vector<8x64xbf16>,
    %68 = vector.extract_strided_slice %65 {offsets = [8, 0], sizes = [8, 64], strides = [1, 1]} : vector<32x64xbf16> to vector<8x64xbf16>
    %c8_33 = arith.constant 8 : index
    %c64_34 = arith.constant 64 : index
    %69 = vector.load %arg13[%c8_33, %c64_34] : memref<32x256xbf16, #tpu.memory_space<vmem>>, vector<8x64xbf16>
    tpu.vector_store %arg13[%c8_33, %c64_34], %68 {strides = array<i32>} : memref<32x256xbf16, #tpu.memory_space<vmem>>, vector<8x64xbf16>,
    %70 = vector.extract_strided_slice %65 {offsets = [16, 0], sizes = [8, 64], strides = [1, 1]} : vector<32x64xbf16> to vector<8x64xbf16>
    %c8_35 = arith.constant 8 : index
    %c128_36 = arith.constant 128 : index
    %71 = vector.load %arg13[%c8_35, %c128_36] : memref<32x256xbf16, #tpu.memory_space<vmem>>, vector<8x64xbf16>
    tpu.vector_store %arg13[%c8_35, %c128_36], %70 {strides = array<i32>} : memref<32x256xbf16, #tpu.memory_space<vmem>>, vector<8x64xbf16>,
    %72 = vector.extract_strided_slice %65 {offsets = [24, 0], sizes = [8, 64], strides = [1, 1]} : vector<32x64xbf16> to vector<8x64xbf16>
    %c8_37 = arith.constant 8 : index
    %c192_38 = arith.constant 192 : index
    %73 = vector.load %arg13[%c8_37, %c192_38] : memref<32x256xbf16, #tpu.memory_space<vmem>>, vector<8x64xbf16>
    tpu.vector_store %arg13[%c8_37, %c192_38], %72 {strides = array<i32>} : memref<32x256xbf16, #tpu.memory_space<vmem>>, vector<8x64xbf16>,
    %74 = vector.extract_strided_slice %8 {offsets = [0, 256], sizes = [32, 128], strides = [1, 1]} : vector<32x512xf32> to vector<32x128xf32>
    %cst_39 = arith.constant dense<0xFF800000> : vector<32xf32>
    %75 = vector.multi_reduction <maximumf>, %74, %cst_39 [1] : vector<32x128xf32> to vector<32xf32>
    %76 = vector.shape_cast %75 : vector<32xf32> to vector<32x1xf32>
    %77 = vector.broadcast %76 : vector<32x1xf32> to vector<32x128xf32>
    %78 = arith.subf %74, %77 : vector<32x128xf32>
    %79 = math.exp %78 : vector<32x128xf32>
    %cst_40 = arith.constant dense<0.000000e+00> : vector<32xf32>
    %80 = vector.multi_reduction <add>, %79, %cst_40 [1] : vector<32x128xf32> to vector<32xf32>
    %81 = vector.shape_cast %80 : vector<32xf32> to vector<32x1xf32>
    %82 = tpu.reciprocal %81 {approx = true} : vector<32x1xf32> -> vector<32x1xf32>
    %83 = vector.broadcast %82 : vector<32x1xf32> to vector<32x128xf32>
    %84 = arith.mulf %79, %83 : vector<32x128xf32>
    %c0_41 = arith.constant 0 : index
    %c256 = arith.constant 256 : index
    %c0_42 = arith.constant 0 : index
    %85 = vector.load %arg5[%c0_41, %c256, %c0_42] : memref<1x512x64xbf16, #tpu.memory_space<vmem>>, vector<1x128x64xbf16>
    %86 = vector.shape_cast %85 : vector<1x128x64xbf16> to vector<128x64xbf16>
    %87 = arith.truncf %84 : vector<32x128xf32> to vector<32x128xbf16>
    %cst_43 = arith.constant dense<0.000000e+00> : vector<32x64xf32>
    %88 = tpu.matmul %87, %86, %cst_43 {dimension_numbers = #tpu.dot_dimension_numbers<[1], [0], [0], [1], [0, 0, 1, 1], [], []>} : vector<32x128xbf16>, vector<128x64xbf16>, vector<32x64xf32> -> vector<32x64xf32>
    %89 = arith.truncf %88 : vector<32x64xf32> to vector<32x64xbf16>
    %90 = vector.extract_strided_slice %89 {offsets = [0, 0], sizes = [8, 64], strides = [1, 1]} : vector<32x64xbf16> to vector<8x64xbf16>
    %c16 = arith.constant 16 : index
    %c0_44 = arith.constant 0 : index
    %91 = vector.load %arg13[%c16, %c0_44] : memref<32x256xbf16, #tpu.memory_space<vmem>>, vector<8x64xbf16>
    tpu.vector_store %arg13[%c16, %c0_44], %90 {strides = array<i32>} : memref<32x256xbf16, #tpu.memory_space<vmem>>, vector<8x64xbf16>,
    %92 = vector.extract_strided_slice %89 {offsets = [8, 0], sizes = [8, 64], strides = [1, 1]} : vector<32x64xbf16> to vector<8x64xbf16>
    %c16_45 = arith.constant 16 : index
    %c64_46 = arith.constant 64 : index
    %93 = vector.load %arg13[%c16_45, %c64_46] : memref<32x256xbf16, #tpu.memory_space<vmem>>, vector<8x64xbf16>
    tpu.vector_store %arg13[%c16_45, %c64_46], %92 {strides = array<i32>} : memref<32x256xbf16, #tpu.memory_space<vmem>>, vector<8x64xbf16>,
    %94 = vector.extract_strided_slice %89 {offsets = [16, 0], sizes = [8, 64], strides = [1, 1]} : vector<32x64xbf16> to vector<8x64xbf16>
    %c16_47 = arith.constant 16 : index
    %c128_48 = arith.constant 128 : index
    %95 = vector.load %arg13[%c16_47, %c128_48] : memref<32x256xbf16, #tpu.memory_space<vmem>>, vector<8x64xbf16>
    tpu.vector_store %arg13[%c16_47, %c128_48], %94 {strides = array<i32>} : memref<32x256xbf16, #tpu.memory_space<vmem>>, vector<8x64xbf16>,
    %96 = vector.extract_strided_slice %89 {offsets = [24, 0], sizes = [8, 64], strides = [1, 1]} : vector<32x64xbf16> to vector<8x64xbf16>
    %c16_49 = arith.constant 16 : index
    %c192_50 = arith.constant 192 : index
    %97 = vector.load %arg13[%c16_49, %c192_50] : memref<32x256xbf16, #tpu.memory_space<vmem>>, vector<8x64xbf16>
    tpu.vector_store %arg13[%c16_49, %c192_50], %96 {strides = array<i32>} : memref<32x256xbf16, #tpu.memory_space<vmem>>, vector<8x64xbf16>,
    %98 = vector.extract_strided_slice %8 {offsets = [0, 384], sizes = [32, 128], strides = [1, 1]} : vector<32x512xf32> to vector<32x128xf32>
    %cst_51 = arith.constant dense<0xFF800000> : vector<32xf32>
    %99 = vector.multi_reduction <maximumf>, %98, %cst_51 [1] : vector<32x128xf32> to vector<32xf32>
    %100 = vector.shape_cast %99 : vector<32xf32> to vector<32x1xf32>
    %101 = vector.broadcast %100 : vector<32x1xf32> to vector<32x128xf32>
    %102 = arith.subf %98, %101 : vector<32x128xf32>
    %103 = math.exp %102 : vector<32x128xf32>
    %cst_52 = arith.constant dense<0.000000e+00> : vector<32xf32>
    %104 = vector.multi_reduction <add>, %103, %cst_52 [1] : vector<32x128xf32> to vector<32xf32>
    %105 = vector.shape_cast %104 : vector<32xf32> to vector<32x1xf32>
    %106 = tpu.reciprocal %105 {approx = true} : vector<32x1xf32> -> vector<32x1xf32>
    %107 = vector.broadcast %106 : vector<32x1xf32> to vector<32x128xf32>
    %108 = arith.mulf %103, %107 : vector<32x128xf32>
    %c0_53 = arith.constant 0 : index
    %c384 = arith.constant 384 : index
    %c0_54 = arith.constant 0 : index
    %109 = vector.load %arg5[%c0_53, %c384, %c0_54] : memref<1x512x64xbf16, #tpu.memory_space<vmem>>, vector<1x128x64xbf16>
    %110 = vector.shape_cast %109 : vector<1x128x64xbf16> to vector<128x64xbf16>
    %111 = arith.truncf %108 : vector<32x128xf32> to vector<32x128xbf16>
    %cst_55 = arith.constant dense<0.000000e+00> : vector<32x64xf32>
    %112 = tpu.matmul %111, %110, %cst_55 {dimension_numbers = #tpu.dot_dimension_numbers<[1], [0], [0], [1], [0, 0, 1, 1], [], []>} : vector<32x128xbf16>, vector<128x64xbf16>, vector<32x64xf32> -> vector<32x64xf32>
    %113 = arith.truncf %112 : vector<32x64xf32> to vector<32x64xbf16>
    %114 = vector.extract_strided_slice %113 {offsets = [0, 0], sizes = [8, 64], strides = [1, 1]} : vector<32x64xbf16> to vector<8x64xbf16>
    %c24 = arith.constant 24 : index
    %c0_56 = arith.constant 0 : index
    %115 = vector.load %arg13[%c24, %c0_56] : memref<32x256xbf16, #tpu.memory_space<vmem>>, vector<8x64xbf16>
    tpu.vector_store %arg13[%c24, %c0_56], %114 {strides = array<i32>} : memref<32x256xbf16, #tpu.memory_space<vmem>>, vector<8x64xbf16>,
    %116 = vector.extract_strided_slice %113 {offsets = [8, 0], sizes = [8, 64], strides = [1, 1]} : vector<32x64xbf16> to vector<8x64xbf16>
    %c24_57 = arith.constant 24 : index
    %c64_58 = arith.constant 64 : index
    %117 = vector.load %arg13[%c24_57, %c64_58] : memref<32x256xbf16, #tpu.memory_space<vmem>>, vector<8x64xbf16>
    tpu.vector_store %arg13[%c24_57, %c64_58], %116 {strides = array<i32>} : memref<32x256xbf16, #tpu.memory_space<vmem>>, vector<8x64xbf16>,
    %118 = vector.extract_strided_slice %113 {offsets = [16, 0], sizes = [8, 64], strides = [1, 1]} : vector<32x64xbf16> to vector<8x64xbf16>
    %c24_59 = arith.constant 24 : index
    %c128_60 = arith.constant 128 : index
    %119 = vector.load %arg13[%c24_59, %c128_60] : memref<32x256xbf16, #tpu.memory_space<vmem>>, vector<8x64xbf16>
    tpu.vector_store %arg13[%c24_59, %c128_60], %118 {strides = array<i32>} : memref<32x256xbf16, #tpu.memory_space<vmem>>, vector<8x64xbf16>,
    %120 = vector.extract_strided_slice %113 {offsets = [24, 0], sizes = [8, 64], strides = [1, 1]} : vector<32x64xbf16> to vector<8x64xbf16>
    %c24_61 = arith.constant 24 : index
    %c192_62 = arith.constant 192 : index
    %121 = vector.load %arg13[%c24_61, %c192_62] : memref<32x256xbf16, #tpu.memory_space<vmem>>, vector<8x64xbf16>
    tpu.vector_store %arg13[%c24_61, %c192_62], %120 {strides = array<i32>} : memref<32x256xbf16, #tpu.memory_space<vmem>>, vector<8x64xbf16>,
    %c0_63 = arith.constant 0 : index
    %c0_64 = arith.constant 0 : index
    %122 = vector.load %arg8[%c0_63, %c0_64] : memref<8x32xbf16, #tpu.memory_space<vmem>>, vector<8x32xbf16>
    %c0_65 = arith.constant 0 : index
    %c0_66 = arith.constant 0 : index
    %123 = vector.load %arg13[%c0_65, %c0_66] : memref<32x256xbf16, #tpu.memory_space<vmem>>, vector<32x256xbf16>
    %cst_67 = arith.constant dense<0.000000e+00> : vector<8x256xf32>
    %124 = tpu.matmul %122, %123, %cst_67 {dimension_numbers = #tpu.dot_dimension_numbers<[1], [0], [0], [1], [0, 0, 1, 1], [], []>} : vector<8x32xbf16>, vector<32x256xbf16>, vector<8x256xf32> -> vector<8x256xf32>
    %125 = arith.truncf %124 : vector<8x256xf32> to vector<8x256xbf16>
    %126 = vector.extract_strided_slice %125 {offsets = [0, 0], sizes = [8, 64], strides = [1, 1]} : vector<8x256xbf16> to vector<8x64xbf16>
    %c0_68 = arith.constant 0 : index
    %c0_69 = arith.constant 0 : index
    %127 = vector.load %arg14[%c0_68, %c0_69] : memref<32x64xbf16, #tpu.memory_space<vmem>>, vector<8x64xbf16>
    tpu.vector_store %arg14[%c0_68, %c0_69], %126 {strides = array<i32>} : memref<32x64xbf16, #tpu.memory_space<vmem>>, vector<8x64xbf16>,
    %128 = vector.extract_strided_slice %125 {offsets = [0, 64], sizes = [8, 64], strides = [1, 1]} : vector<8x256xbf16> to vector<8x64xbf16>
    %c8_70 = arith.constant 8 : index
    %c0_71 = arith.constant 0 : index
    %129 = vector.load %arg14[%c8_70, %c0_71] : memref<32x64xbf16, #tpu.memory_space<vmem>>, vector<8x64xbf16>
    tpu.vector_store %arg14[%c8_70, %c0_71], %128 {strides = array<i32>} : memref<32x64xbf16, #tpu.memory_space<vmem>>, vector<8x64xbf16>,
    %130 = vector.extract_strided_slice %125 {offsets = [0, 128], sizes = [8, 64], strides = [1, 1]} : vector<8x256xbf16> to vector<8x64xbf16>
    %c16_72 = arith.constant 16 : index
    %c0_73 = arith.constant 0 : index
    %131 = vector.load %arg14[%c16_72, %c0_73] : memref<32x64xbf16, #tpu.memory_space<vmem>>, vector<8x64xbf16>
    tpu.vector_store %arg14[%c16_72, %c0_73], %130 {strides = array<i32>} : memref<32x64xbf16, #tpu.memory_space<vmem>>, vector<8x64xbf16>,
    %132 = vector.extract_strided_slice %125 {offsets = [0, 192], sizes = [8, 64], strides = [1, 1]} : vector<8x256xbf16> to vector<8x64xbf16>
    %c24_74 = arith.constant 24 : index
    %c0_75 = arith.constant 0 : index
    %133 = vector.load %arg14[%c24_74, %c0_75] : memref<32x64xbf16, #tpu.memory_space<vmem>>, vector<8x64xbf16>
    tpu.vector_store %arg14[%c24_74, %c0_75], %132 {strides = array<i32>} : memref<32x64xbf16, #tpu.memory_space<vmem>>, vector<8x64xbf16>,
    %c0_76 = arith.constant 0 : index
    %c0_77 = arith.constant 0 : index
    %134 = vector.load %arg14[%c0_76, %c0_77] : memref<32x64xbf16, #tpu.memory_space<vmem>>, vector<32x64xbf16>
    %c0_78 = arith.constant 0 : index
    %c0_79 = arith.constant 0 : index
    %135 = vector.load %arg9[%c0_78, %c0_79] : memref<64x128xbf16, #tpu.memory_space<vmem>>, vector<64x128xbf16>
    %cst_80 = arith.constant dense<0.000000e+00> : vector<32x128xf32>
    %136 = tpu.matmul %134, %135, %cst_80 {dimension_numbers = #tpu.dot_dimension_numbers<[1], [0], [0], [1], [0, 0, 1, 1], [], []>} : vector<32x64xbf16>, vector<64x128xbf16>, vector<32x128xf32> -> vector<32x128xf32>
    %c0_81 = arith.constant 0 : index
    %c0_82 = arith.constant 0 : index
    %137 = vector.load %arg10[%c0_81, %c0_82] : memref<64x128xbf16, #tpu.memory_space<vmem>>, vector<64x128xbf16>
    %cst_83 = arith.constant dense<0.000000e+00> : vector<32x128xf32>
    %138 = tpu.matmul %25, %137, %cst_83 {dimension_numbers = #tpu.dot_dimension_numbers<[1], [0], [0], [1], [0, 0, 1, 1], [], []>} : vector<32x64xbf16>, vector<64x128xbf16>, vector<32x128xf32> -> vector<32x128xf32>
    %139 = arith.addf %136, %138 : vector<32x128xf32>
    %c0_84 = arith.constant 0 : index
    %c0_85 = arith.constant 0 : index
    %140 = vector.load %arg11[%c0_84, %c0_85] : memref<1x128xf32, #tpu.memory_space<vmem>>, vector<1x128xf32>
    %141 = vector.broadcast %140 : vector<1x128xf32> to vector<32x128xf32>
    %142 = arith.addf %139, %141 : vector<32x128xf32>
    %cst_86 = arith.constant 0.000000e+00 : f32
    %143 = vector.broadcast %cst_86 : f32 to vector<32x128xf32>
    %144 = arith.maximumf %142, %143 : vector<32x128xf32>
    %145 = arith.truncf %144 : vector<32x128xf32> to vector<32x128xbf16>
    %c0_87 = arith.constant 0 : index
    %c0_88 = arith.constant 0 : index
    %c0_89 = arith.constant 0 : index
    %146 = vector.load %arg12[%c0_87, %c0_88, %c0_89] : memref<1x32x128xbf16, #tpu.memory_space<vmem>>, vector<1x32x128xbf16>
    %147 = vector.shape_cast %146 : vector<1x32x128xbf16> to vector<32x128xbf16>
    %148 = vector.shape_cast %145 : vector<32x128xbf16> to vector<1x32x128xbf16>
    tpu.vector_store %arg12[%c0_87, %c0_88, %c0_89], %148 {strides = array<i32>} : memref<1x32x128xbf16, #tpu.memory_space<vmem>>, vector<1x32x128xbf16>,
    return
  }
  func.func @transform_0(%arg0: i32, %arg1: i32) -> (i32, i32, i32) {
    %c0_i32 = arith.constant 0 : i32
    %c0_i32_0 = arith.constant 0 : i32
    return %arg0, %arg1, %c0_i32 : i32, i32, i32
  }
  func.func @transform_1(%arg0: i32, %arg1: i32) -> (i32, i32, i32) {
    %c0_i32 = arith.constant 0 : i32
    %c0_i32_0 = arith.constant 0 : i32
    %c0_i32_1 = arith.constant 0 : i32
    return %arg0, %c0_i32, %c0_i32_0 : i32, i32, i32
  }
  func.func @transform_2(%arg0: i32, %arg1: i32) -> (i32, i32, i32) {
    %c0_i32 = arith.constant 0 : i32
    %c0_i32_0 = arith.constant 0 : i32
    %c0_i32_1 = arith.constant 0 : i32
    return %arg0, %c0_i32, %c0_i32_0 : i32, i32, i32
  }
  func.func @transform_3(%arg0: i32, %arg1: i32) -> (i32, i32, i32) {
    %c0_i32 = arith.constant 0 : i32
    %c0_i32_0 = arith.constant 0 : i32
    %c0_i32_1 = arith.constant 0 : i32
    return %arg0, %c0_i32, %c0_i32_0 : i32, i32, i32
  }
  func.func @transform_4(%arg0: i32, %arg1: i32) -> (i32, i32) {
    %c0_i32 = arith.constant 0 : i32
    %c0_i32_0 = arith.constant 0 : i32
    %c0_i32_1 = arith.constant 0 : i32
    return %c0_i32, %c0_i32_0 : i32, i32
  }
  func.func @transform_5(%arg0: i32, %arg1: i32) -> (i32, i32) {
    %c0_i32 = arith.constant 0 : i32
    %c0_i32_0 = arith.constant 0 : i32
    %c0_i32_1 = arith.constant 0 : i32
    return %c0_i32, %c0_i32_0 : i32, i32
  }
  func.func @transform_6(%arg0: i32, %arg1: i32) -> (i32, i32) {
    %c0_i32 = arith.constant 0 : i32
    %c0_i32_0 = arith.constant 0 : i32
    %c0_i32_1 = arith.constant 0 : i32
    return %c0_i32, %c0_i32_0 : i32, i32
  }
  func.func @transform_7(%arg0: i32, %arg1: i32) -> (i32, i32) {
    %c0_i32 = arith.constant 0 : i32
    %c0_i32_0 = arith.constant 0 : i32
    %c0_i32_1 = arith.constant 0 : i32
    return %c0_i32, %c0_i32_0 : i32, i32
  }
  func.func @transform_8(%arg0: i32, %arg1: i32) -> (i32, i32) {
    %c0_i32 = arith.constant 0 : i32
    %c0_i32_0 = arith.constant 0 : i32
    %c0_i32_1 = arith.constant 0 : i32
    return %c0_i32, %c0_i32_0 : i32, i32
  }
  func.func @transform_9(%arg0: i32, %arg1: i32) -> (i32, i32) {
    %c0_i32 = arith.constant 0 : i32
    %c0_i32_0 = arith.constant 0 : i32
    %c0_i32_1 = arith.constant 0 : i32
    return %c0_i32, %c0_i32_0 : i32, i32
  }
  func.func @transform_10(%arg0: i32, %arg1: i32) -> (i32, i32, i32) {
    %c0_i32 = arith.constant 0 : i32
    %c0_i32_0 = arith.constant 0 : i32
    return %arg0, %arg1, %c0_i32 : i32, i32, i32
  }
}

</mosaic_0001>

<bundles_post_ra>
// kernel: tpu_custom_call.1
= control target key start
LH: loop header
LB: loop body
LE: loop exit
PB: predicated region body
PF: predicated region fallthrough
CT: control target
= control target key end

     0   :  { %s3217_s0 = inlined_call_operand.vmem [shape: bf16[2,64,64], index: 0, kind: input, shape index: {}]   ;;  %s3218_s1 = inlined_call_operand.vmem [shape: bf16[2,64,512], index: 1, kind: input, shape index: {}]   ;;  %s3219_s2 = inlined_call_operand.vmem [shape: f32[2,1,512], index: 2, kind: input, shape index: {}]   ;;  %s3220_s3 = inlined_call_operand.vmem [shape: bf16[2,512,64], index: 3, kind: input, shape index: {}]   ;;  %s3221_s4 = inlined_call_operand.vmem [shape: bf16[64,256], index: 4, kind: input, shape index: {}]   ;;  %s3222_s5 = inlined_call_operand.vmem [shape: f32[1,256], index: 5, kind: input, shape index: {}]   ;;  %s3223_s6 = inlined_call_operand.vmem [shape: bf16[8,32], index: 6, kind: input, shape index: {}]   ;;  %s3224_s7 = inlined_call_operand.vmem [shape: bf16[64,128], index: 7, kind: input, shape index: {}]   ;;  %s3225_s8 = inlined_call_operand.vmem [shape: bf16[64,128], index: 8, kind: input, shape index: {}]   ;;  %s3226_s9 = inlined_call_operand.vmem [shape: f32[1,128], index: 9, kind: input, shape index: {}]   ;;  %s3227_s10 = inlined_call_operand.hbm [shape: bf16[2,64,128], index: 10, kind: output, shape index: {}]  }
   0x1   :  { %3229 = sst [smem:[#allocation8_spill]] %s3217_s0 }
   0x2   :  { %3230 = sst [smem:[#allocation9_spill]] %s3218_s1 }
   0x3   :  { %3231 = sst [smem:[#allocation10_spill]] %s3219_s2 }
   0x4   :  { %15 = vsyncpa [#allocation5], 0 }
   0x5   :  { %17 = vsyncpa [#allocation5 + $0x1], 0  ;;  %s2664_s13 = smov 0   ;;  %s2666_s14 = smov 0  }
   0x6   :  { %s2668_s15 = smov 0   ;;  %s2670_s16 = smov 0  }
   0x7   :  { %s2672_s17 = smov 0   ;;  %s2674_s18 = smov 0  }
   0x8   :  { %s2676_s19 = smov 0   ;;  %s2678_s20 = smov 0  }
   0x9 LB: > { %s1986_s21 = sadd.s32 4294967295, %s2603_s20   ;;  %s1987_s22 = sadd.s32 4294967294, %s2603_s20   ;;  %s2603_s20 = sphi %s2678_s20, %s23_s20   ;;  %s2599_s19 = sphi %s2676_s19, %s3245_s19   ;;  %s2595_s18 = sphi %s2674_s18, %s3244_s18   ;;  %s2591_s17 = sphi %s2672_s17, %s3243_s17   ;;  %s2587_s16 = sphi %s2670_s16, %s3242_s16   ;;  %s2583_s15 = sphi %s2668_s15, %s3241_s15   ;;  %s2579_s14 = sphi %s2666_s14, %s3240_s14   ;;  %s2575_s13 = sphi %s2664_s13, %s3239_s13  }
   0xa   : > { %s32_s23 = sadd.s32 1, %s2595_s18  ;;  %s35_s24 = sadd.s32 1, %s2599_s19 }
   0xb   : > { %p33_p0 = scmp.ge.s32.totalorder %s32_s23, 2  ;;  %p286_p1 = scmp.ne.s32.totalorder %s2583_s15, %s2579_s14 }
   0xc   : > { %p287_p2 = scmp.eq.s32.totalorder %s1986_s21, 3  ;;  %p292_p5 = scmp.ne.s32.totalorder %s2579_s14, %s2575_s13 }
   0xd   : > { %s3247_s23 = smov (%p33_p0, %s32_s23), 0  ;;  %s3249_s24 = smov (!%p33_p0, %s35_s24), %s2599_s19 }
   0xe   : > { %s272_s25 = ssub.s32 %s2595_s18, %s3247_s23  ;;  %p2715_p3 = por %p287_p2, %p286_p1 }
   0xf   : > { %p37_p4 = scmp.ge.s32.totalorder %s3249_s24, 2  ;;  %p293_p6 = scmp.eq.s32.totalorder %s1987_s22, 3 }
  0x10   : > { %p1990_p7 = scmp.ge.s32.totalorder %s2603_s20, 1  ;;  %p365_p9 = scmp.lt.s32.totalorder %s2603_s20, 5 }
  0x11   : > { %s3251_s24 = smov (%p37_p4, %s3249_s24), 0  ;;  %p2724_p8 = por %p293_p6, %p292_p5 }
  0x12   : > { %3233 = sst [smem:[#allocation7_spill]] %s3251_s24  ;;  %s271_s28 = ssub.s32 %s2599_s19, %s3251_s24 }
  0x13   : > { %s276_s29 = sadd.s32 1, %s2583_s15  ;;  %s273_s30 = sor.u32 %s272_s25, %s271_s28 }
  0x14   : > { %p366_p10 = pnand %p1990_p7, %p365_p9  ;;  %p274_p11 = scmp.eq.s32.totalorder %s273_s30, 0 }
  0x15   : > { %p422_p12 = scmp.lt.s32.totalorder (!%p366_p10), %s2591_s17, 1  ;;  %s2737_s12 = sshll.u32 (!%p366_p10), %s2587_s16, 2 }
  0x16   : > { %s2733_s11 = scalar_select %p274_p11, %s2583_s15, %s276_s29  }
  0x17   : > { %369 = sbr.rel (%p366_p10) target bundleno = 1483 (0x5cb), region = 60  ;;  %p424_p13 = scmp.lt.s32.totalorder (!%p366_p10), %s2737_s12, 7 }
  0x18   : > { %s3235_s1 = sld [smem:[#allocation9_spill]] (!%p366_p10) }
  0x19   : > { %s3236_s0 = sld [smem:[#allocation8_spill]] (!%p366_p10) }
  0x1a   : > { %s3237_s2 = sld [smem:[#allocation10_spill]] (!%p366_p10) }
  0x1c   : > { %v2605_v0 = vmov 0   ;;  %s2743_s21 = scalar_select %p422_p12, %s2591_s17, 1  ;;  %vm579_vm0 = vcmask 523264   ;;  %v469_v19 = vlaneseq  ;;  %v2387_v62 = vld [vmem:[%s3221_s4 + $0x30] ss:$8 sps:$4 sm:$0xff]   ;;  %vm1016_vm1 = vcmask 519168  }
  0x1d   : > { %618 = vmatprep.mubr.bf16.mxu0 %v2605_v0  ;;  %671 = vmatprep.mubr.bf16.mxu1 %v2605_v0  ;;  %s425_s22 = scalar_select %p424_p13, %s2737_s12, 7  ;;  %v2389_v63 = vld [vmem:[%s3221_s4 + $0x34] ss:$8 sps:$4 sm:$0xff]   ;;  %vm1024_vm2 = vcmask 1043968   ;;  %vm1566_vm3 = vcmask 261120  }
  0x1e   : > { %s2104_s25 = sshll.u32 %s2743_s21, 7  ;;  %s1993_s16 = sshll.u32 %s2743_s21, 3  ;;  %v2794_v20 = vshrl.u32 %v469_v19, 7 }
  0x1f   : > { %s2750_s30 = scalar_lea.vmem %s3235_s1, %s2104_s25  ;;  %s427_s24 = sadd.s32 %s1993_s16, %s425_s22 }
  0x20   : > { %v2361_v1 = vld [vmem:[%s2750_s30 + $0x64] ss:$16 sps:$4 sm:$0xff]   ;;  %v2363_v2 = vld [vmem:[%s2750_s30 + $0x60] ss:$16 sps:$4 sm:$0xff]   ;;  %s1994_s25 = sshll.u32 %s427_s24, 2  ;;  %s2105_s22 = sshll.u32 %s2743_s21, 8 }
  0x21   : > { %594 = vmatprep.subr.bf16.mxu0 %v2361_v1  ;;  %v2364_v3 = vld [vmem:[%s2750_s30 + $0x44] ss:$16 sps:$4 sm:$0xff]   ;;  %v2366_v4 = vld [vmem:[%s2750_s30 + $0x40] ss:$16 sps:$4 sm:$0xff]   ;;  %s429_s1 = scalar_lea.vmem %s3236_s0, %s1994_s25  ;;  %v2374_v7 = vld [vmem:[%s2750_s30 + $0x6c] ss:$16 sps:$4 sm:$0xff]   ;;  %s2773_s25 = scalar_lea.vmem %s3220_s3, %s2105_s22 }
  0x22   : > { %595 = vmatpush1.bf16.msra.mxu0 %v2363_v2  ;;  %v2367_v5 = vld [vmem:[%s2750_s30 + $0x24] ss:$16 sps:$4 sm:$0xff]   ;;  %v2369_v6 = vld [vmem:[%s2750_s30 + $0x20] ss:$16 sps:$4 sm:$0xff]   ;;  %v2376_v8 = vld [vmem:[%s2750_s30 + $0x68] ss:$16 sps:$4 sm:$0xff]   ;;  %647 = vmatprep.subr.bf16.mxu1 %v2374_v7 }
  0x23   : > { %596 = vmatprep.subr.bf16.mxu0 %v2364_v3  ;;  %v2370_v9 = vld [vmem:[%s2750_s30 + $0x4] ss:$16 sps:$4 sm:$0xff]   ;;  %v2377_v10 = vld [vmem:[%s2750_s30 + $0x4c] ss:$16 sps:$4 sm:$0xff]   ;;  %v2372_v11 = vld [vmem:[%s2750_s30] ss:$16 sps:$4 sm:$0xff]   ;;  %648 = vmatpush1.bf16.msra.mxu1 %v2376_v8 }
  0x24   : > { %v2379_v12 = vld [vmem:[%s2750_s30 + $0x48] ss:$16 sps:$4 sm:$0xff]   ;;  %649 = vmatprep.subr.bf16.mxu1 %v2377_v10  ;;  %v2381_v13 = vld [vmem:[%s2750_s30 + $0x2c] ss:$16 sps:$4 sm:$0xff]   ;;  %v2775_v14 = vld [vmem:[%s429_s1] sm:$0xff]   ;;  %v471_v21 = vsub.s32 0, %v2794_v20 }
  0x25   : > { %v2383_v15 = vld [vmem:[%s2750_s30 + $0x28] ss:$16 sps:$4 sm:$0xff]   ;;  %v2384_v16 = vld [vmem:[%s2750_s30 + $0xc] ss:$16 sps:$4 sm:$0xff]   ;;  %v475_v23 = vsub.s32 1, %v2794_v20  ;;  %v479_v34 = vsub.s32 2, %v2794_v20 }
  0x26   : > { %597 = vmatpush1.bf16.msra.mxu0 %v2366_v4  ;;  %v2386_v17 = vld [vmem:[%s2750_s30 + $0x8] ss:$16 sps:$4 sm:$0xff]   ;;  %s1997_s30 = sshll.u32 %s2743_s21, 2  ;;  %v483_v41 = vsub.s32 3, %v2794_v20  ;;  %v2392_v1 = vld [vmem:[%s3221_s4 + $0x24] ss:$8 sps:$4 sm:$0xff]  }
  0x27   : > { %598 = vmatprep.subr.bf16.mxu0 %v2367_v5  ;;  %650 = vmatpush1.bf16.msra.mxu1 %v2379_v12  ;;  %v2783_v18 = vld [vmem:[%s429_s1 + $0x8] sm:$0xff]   ;;  %s439_s29 = scalar_lea.vmem %s3237_s2, %s1997_s30  ;;  %v2399_v2 = vld [vmem:[%s2773_s25 + $0x38] sm:$0xff]   ;;  %s418_s0 = sand.u32 1, %s2579_s14  }
  0x28   : > { %651 = vmatprep.subr.bf16.mxu1 %v2381_v13  ;;  %v467_v22 = vld [vmem:[%s439_s29] sm:$0xf]  ;;  %v2395_v4 = vld [vmem:[%s3221_s4 + $0x14] ss:$8 sps:$4 sm:$0xff]   ;;  %v2393_v5 = vld [vmem:[%s3221_s4 + $0x10] ss:$8 sps:$4 sm:$0xff]  }
  0x29   : > { %v472_v24 = vrot.slane %v467_v22, %v471_v21  ;;  %v476_v25 = vrot.slane %v467_v22, %v475_v23  ;;  %v480_v40 = vrot.slane %v467_v22, %v479_v34  ;;  %v484_v49 = vrot.slane %v467_v22, %v483_v41  ;;  %v2390_v3 = vld [vmem:[%s3221_s4 + $0x20] ss:$8 sps:$4 sm:$0xff]   ;;  %s1991_s29 = sshll.u32 %s418_s0, 4  ;;  %s2100_s21 = sshll.u32 %s2591_s17, 3 }
  0x2a   : > { %599 = vmatpush1.bf16.msra.mxu0 %v2369_v6  ;;  %v2398_v6 = vld [vmem:[%s3221_s4 + $0x4] ss:$8 sps:$4 sm:$0xff]   ;;  %v2396_v7 = vld [vmem:[%s3221_s4] ss:$8 sps:$4 sm:$0xff]   ;;  %s1865_s22 = sadd.s32 %s2100_s21, %s2737_s12  ;;  %s420_s24 = scalar_lea.vmem [#allocation4], %s1991_s29 }
  0x2b   : > { %600 = vmatprep.subr.bf16.mxu0 %v2370_v9  ;;  %652 = vmatpush1.bf16.msra.mxu1 %v2383_v15  ;;  %s1868_s16 = sshll.u32 %s420_s24, 4  ;;  %s2101_s30 = sshll.u32 %s1865_s22, 6  ;;  %s3155_s16 = int_to_ptr.vmem [resolvable:$true] %s1868_s16 }
  0x2c   : > { %653 = vmatprep.subr.bf16.mxu1 %v2384_v16  ;;  %s3160_s12 = scalar_lea.hbm %s3227_s10, %s2101_s30  ;;  %s3164_s2 = scalar_lea.sflag [#allocation5], %s418_s0 }
  0x2d   : > { %s2511_s28 = scalar_lea.vmem %s3155_s16, 256  ;;  %s2607_s29 = smov [#allocation4]  }
  0x2e   : > { %601 = vmatpush1.bf16.msra.mxu0 %v2372_v11  ;;  %p2512_p0 = scmp.ne.s32.totalorder %s3155_s16, %s2511_s28  ;;  %s2515_s21 = sshll.u32 %s2607_s29, 4  ;;  %s2516_s21 = int_to_ptr.vmem [resolvable:$false] %s2515_s21 }
  0x2f   : > { %654 = vmatpush1.bf16.msra.mxu1 %v2386_v17  ;;  %760 = vmatprep.subr.bf16.mxu0 %v2389_v63  ;;  %s2517_s22 = scalar_lea.vmem %s2516_s21, 512  ;;  %p2518_p4 = scmp.lt.s32.totalorder %s3155_s16, %s2516_s21 }
  0x30   : > { %2183 = vmatprep.subr.bf16.mxu1 %v2399_v2  ;;  %p2513_p1 = pnand %p2512_p0, %p2715_p3  ;;  %p2519_p5 = scmp.lt.s32.totalorder %s2517_s22, %s2511_s28 }
  0x31   : > { %2018 = vmatmul.mubr.msk.bf16.vlgmr.msra.gmra.mxu0 %vm579_vm0, %v2775_v14 }
  0x32   : > { %628 = vmatprep.mubr.bf16.mxu0 %v2605_v0  ;;  %2020 = vmatmul.mubr.msk.bf16.vlgmr.msra.gmra.mxu1 %vm579_vm0, %v2775_v14  ;;  %p2514_p2 = pneg %p2513_p1  ;;  %p2520_p6 = por %p2519_p5, %p2518_p4 }
  0x33   : > { %681 = vmatprep.mubr.bf16.mxu1 %v2605_v0  ;;  %761 = vmatpush1.bf16.msra.mxu0 %v2387_v62 }
  0x34   : > { %762 = vmatprep.subr.bf16.mxu0 %v2392_v1  ;;  %2184 = vmatpush3.bf16.msra.mxu1 %v2399_v2  ;;  %v2400_v1 = vld [vmem:[%s2773_s25 + $0x30] sm:$0xff]   ;;  %p2521_p7 = pnand %p2520_p6, %p2514_p2 }
  0x35   : > { %2185 = vmatprep.subr.bf16.mxu1 %v2400_v1 }
  0x37   : > { %763 = vmatpush1.bf16.msra.mxu0 %v2390_v3 }
  0x38   : > { %764 = vmatprep.subr.bf16.mxu0 %v2395_v4  ;;  %2186 = vmatpush3.bf16.msra.mxu1 %v2400_v1 }
  0x39   : > { %2019 = vmatmul.mubr.msk.bf16.gmra.mxu0 %vm579_vm0, %v2783_v18 }
  0x3a   : > { %784 = vmatprep.mubr.bf16.mxu0 %v2605_v0  ;;  %2021 = vmatmul.mubr.msk.bf16.gmra.mxu1 %vm579_vm0, %v2783_v18 }
  0x3b   : > { %765 = vmatpush1.bf16.msra.mxu0 %v2393_v5 }
  0x3c   : > { %766 = vmatprep.subr.bf16.mxu0 %v2398_v6  ;;  %v2403_v6 = vld [vmem:[%s2773_s25 + $0x70] sm:$0xff]  }
  0x3f   : > { %767 = vmatpush1.bf16.msra.mxu0 %v2396_v7 }
  0x42   : > { %2030 = vmatmul.mubr.msk.bf16.vlgmr.msra.gmra.mxu0 %vm579_vm0, %v2775_v14 }
  0x43   : > { %794 = vmatprep.mubr.bf16.mxu0 %v2605_v0 }
  0x4a   : > { %2031 = vmatmul.mubr.msk.bf16.gmra.mxu0 %vm579_vm0, %v2783_v18 }
  0xf1   : > { %v620_v26 = vpop.f32.mrf.mxu0 }
  0xf2   : > { %v2805_v27 = vadd.f32 %v620_v26, %v472_v24  ;;  %v673_v35 = vpop.f32.mrf.mxu1 }
  0xf3   : > { %v622_v28 = vpop.f32.mrf.mxu0  ;;  %v2828_v48 = vadd.f32 %v673_v35, %v480_v40 }
  0xf4   : > { %v2807_v29 = vadd.f32 %v622_v28, %v476_v25  ;;  %863 = vmax.xlane.f32.xlu0 %v2805_v27  ;;  %v675_v38 = vpop.f32.mrf.mxu1 }
  0xf5   : > { %v624_v30 = vpop.f32.mrf.mxu0  ;;  %v2832_v52 = vadd.f32 %v675_v38, %v484_v49 }
  0xf6   : > { %v2810_v31 = vadd.f32 %v624_v30, %v472_v24  ;;  %1034 = vmax.xlane.f32.xlu1 %v2807_v29  ;;  %v677_v42 = vpop.f32.mrf.mxu1 }
  0xf7   : > { %v626_v32 = vpop.f32.mrf.mxu0  ;;  %v2836_v53 = vadd.f32 %v677_v42, %v480_v40 }
  0xf8   : > { %v2813_v33 = vadd.f32 %v626_v32, %v476_v25  ;;  %865 = vmax.xlane.f32.xlu0 %v2810_v31  ;;  %v679_v46 = vpop.f32.mrf.mxu1 }
  0xf9   : > { %v630_v36 = vpop.f32.mrf.mxu0  ;;  %v2838_v55 = vadd.f32 %v679_v46, %v484_v49 }
  0xfa   : > { %v2817_v37 = vadd.f32 %v630_v36, %v472_v24  ;;  %1036 = vmax.xlane.f32.xlu1 %v2813_v33  ;;  %v683_v50 = vpop.f32.mrf.mxu1 }
  0xfb   : > { %v632_v39 = vpop.f32.mrf.mxu0  ;;  %v2842_v56 = vadd.f32 %v683_v50, %v480_v40 }
  0xfc   : > { %867 = vmax.xlane.f32.xlu0 %v2817_v37  ;;  %v2822_v44 = vadd.f32 %v632_v39, %v476_v25  ;;  %v685_v54 = vpop.f32.mrf.mxu1 }
  0xfd   : > { %v634_v43 = vpop.f32.mrf.mxu0  ;;  %v2844_v58 = vadd.f32 %v685_v54, %v484_v49 }
  0xfe   : > { %v2824_v45 = vadd.f32 %v634_v43, %v472_v24  ;;  %v687_v57 = vpop.f32.mrf.mxu1 }
  0xff   : > { %v636_v47 = vpop.f32.mrf.mxu0  ;;  %v2848_v59 = vadd.f32 %v687_v57, %v480_v40 }
 0x100   : > { %869 = vmax.xlane.f32.xlu1 %v2824_v45  ;;  %1038 = vmax.xlane.f32.xlu0 %v2822_v44  ;;  %v2830_v51 = vadd.f32 %v636_v47, %v476_v25  ;;  %v689_v60 = vpop.f32.mrf.mxu1 }
 0x101   : > { %v2852_v61 = vadd.f32 %v689_v60, %v484_v49 }
 0x104   : > { %1040 = vmax.xlane.f32.xlu1 %v2830_v51  ;;  %1203 = vmax.xlane.f32.xlu0 %v2828_v48 }
 0x108   : > { %1205 = vmax.xlane.f32.xlu1 %v2836_v53  ;;  %1372 = vmax.xlane.f32.xlu0 %v2832_v52 }
 0x10c   : > { %1374 = vmax.xlane.f32.xlu1 %v2838_v55  ;;  %1207 = vmax.xlane.f32.xlu0 %v2842_v56 }
 0x110   : > { %1209 = vmax.xlane.f32.xlu1 %v2848_v59  ;;  %1376 = vmax.xlane.f32.xlu0 %v2844_v58 }
 0x114   : > { %1378 = vmax.xlane.f32.xlu1 %v2852_v61 }
 0x17d   : > { %v864_v8 = vpop.xlane.xlu0 %863 }
 0x17e   : > { %v871_v9 = vsub.f32 %v2805_v27, %v864_v8 }
 0x17f   : > { %v1035_v10 = vpop.xlane.xlu1 %1034 }
 0x180   : > { %v875_v11 = vmul.f32 1.442695, %v871_v9  ;;  %v1042_v12 = vsub.f32 %v2807_v29, %v1035_v10  ;;  %v2405_v10 = vld [vmem:[%s2773_s25 + $0x68] sm:$0xff]  }
 0x181   : > { %v866_v13 = vpop.xlane.xlu0 %865 }
 0x182   : > { %2447 = vpow2.f32 %v875_v11  ;;  %v1046_v15 = vmul.f32 1.442695, %v1042_v12  ;;  %v872_v16 = vsub.f32 %v2810_v31, %v866_v13  ;;  %v2406_v13 = vld [vmem:[%s2773_s25 + $0x18] sm:$0xff]  }
 0x183   : > { %v1037_v17 = vpop.xlane.xlu1 %1036 }
 0x184   : > { %v877_v19 = vmul.f32 1.442695, %v872_v16  ;;  %v1043_v14 = vsub.f32 %v2813_v33, %v1037_v17  ;;  %2449 = vpow2.f32 %v1046_v15  ;;  %v2407_v15 = vld [vmem:[%s2773_s25 + $0x60] sm:$0xff]  }
 0x185   : > { %v868_v22 = vpop.xlane.xlu0 %867 }
 0x186   : > { %2451 = vpow2.f32 %v877_v19  ;;  %v1048_v18 = vmul.f32 1.442695, %v1043_v14  ;;  %v873_v24 = vsub.f32 %v2817_v37, %v868_v22  ;;  %v2408_v19 = vld [vmem:[%s2773_s25 + $0x10] sm:$0xff]   ;;  %v2409_v14 = vld [vmem:[%s2773_s25 + $0x58] sm:$0xff]  }
 0x188   : > { %v879_v25 = vmul.f32 1.442695, %v873_v24  ;;  %2453 = vpow2.f32 %v1048_v18  ;;  %v2410_v24 = vld [vmem:[%s2773_s25 + $0x8] sm:$0xff]  }
 0x189   : > { %v870_v26 = vpop.xlane.xlu1 %869  ;;  %v1039_v27 = vpop.xlane.xlu0 %1038 }
 0x18a   : > { %2455 = vpow2.f32 %v879_v25  ;;  %v874_v28 = vsub.f32 %v2824_v45, %v870_v26  ;;  %v1044_v29 = vsub.f32 %v2822_v44, %v1039_v27  ;;  %v2411_v25 = vld [vmem:[%s2773_s25 + $0x50] sm:$0xff]   ;;  %v2412_v27 = vld [vmem:[%s2773_s25] sm:$0xff]  }
 0x18c   : > { %v881_v30 = vmul.f32 1.442695, %v874_v28  ;;  %v1050_v31 = vmul.f32 1.442695, %v1044_v29  ;;  %v2413_v28 = vld [vmem:[%s2773_s25 + $0x48] sm:$0xff]   ;;  %v2414_v29 = vld [vmem:[%s2773_s25 + $0x40] sm:$0xff]  }
 0x18d   : > { %v1041_v32 = vpop.xlane.xlu1 %1040  ;;  %v1204_v34 = vpop.xlane.xlu0 %1203 }
 0x18e   : > { %2457 = vpow2.f32 %v881_v30  ;;  %v1045_v33 = vsub.f32 %v2830_v51, %v1041_v32  ;;  %v1211_v35 = vsub.f32 %v2828_v48, %v1204_v34  ;;  %v2965_v30 = vld [vmem:[%s2773_s25 + $0xb8] sm:$0xff]   ;;  %v2975_v32 = vld [vmem:[%s3222_s5] sm:$0x3] }
 0x18f   : > { %v2894_v36 = vpop.eup %2447  ;;  %2459 = vpow2.f32 %v1050_v31  ;;  %v2969_v31 = vld [vmem:[%s2773_s25 + $0xf8] sm:$0xff]   ;;  %v2980_v34 = vrot.slane %v2975_v32, %v475_v23 }
 0x190   : > { %v1052_v37 = vmul.f32 1.442695, %v1045_v33  ;;  %v1215_v38 = vmul.f32 1.442695, %v1211_v35  ;;  %883 = vadd.xlane.f32.xlu0 %v2894_v36  ;;  %v2982_v33 = vpop.f32.mrf.mxu0 }
 0x191   : > { %v1206_v39 = vpop.xlane.xlu1 %1205  ;;  %v1373_v40 = vpop.xlane.xlu0 %1372 }
 0x192   : > { %v2897_v41 = vpop.eup %2449  ;;  %2461 = vpow2.f32 %v1052_v37  ;;  %v1212_v42 = vsub.f32 %v2836_v53, %v1206_v39  ;;  %v1380_v43 = vsub.f32 %v2832_v52, %v1373_v40  ;;  %v788_v35 = vpop.f32.mrf.mxu0 }
 0x193   : > { %v2901_v44 = vpop.eup %2451  ;;  %2463 = vpow2.f32 %v1215_v38  ;;  %v2985_v37 = vadd.f32 %v788_v35, %v2980_v34 }
 0x194   : > { %v1217_v45 = vmul.f32 1.442695, %v1212_v42  ;;  %v1384_v46 = vmul.f32 1.442695, %v1380_v43  ;;  %1054 = vadd.xlane.f32.xlu0 %v2897_v41  ;;  %885 = vadd.xlane.f32.xlu1 %v2901_v44  ;;  %v2987_v38 = vpop.f32.mrf.mxu0 }
 0x195   : > { %v1375_v47 = vpop.xlane.xlu1 %1374  ;;  %v1208_v48 = vpop.xlane.xlu0 %1207 }
 0x196   : > { %v2905_v49 = vpop.eup %2453  ;;  %2465 = vpow2.f32 %v1217_v45  ;;  %v1381_v50 = vsub.f32 %v2838_v55, %v1375_v47  ;;  %v1213_v51 = vsub.f32 %v2842_v56, %v1208_v48  ;;  %v2401_v55 = vld [vmem:[%s2773_s25 + $0x78] sm:$0xff]   ;;  %v2989_v39 = vpop.f32.mrf.mxu0 }
 0x197   : > { %v2909_v52 = vpop.eup %2455  ;;  %2467 = vpow2.f32 %v1384_v46  ;;  %2203 = vmatprep.subr.bf16.mxu0 %v2401_v55 }
 0x198   : > { %v1386_v53 = vmul.f32 1.442695, %v1381_v50  ;;  %v1219_v54 = vmul.f32 1.442695, %v1213_v51  ;;  %1056 = vadd.xlane.f32.xlu1 %v2905_v49  ;;  %887 = vadd.xlane.f32.xlu0 %v2909_v52  ;;  %v2991_v40 = vpop.f32.mrf.mxu0 }
 0x199   : > { %v1210_v57 = vpop.xlane.xlu1 %1209  ;;  %v1377_v60 = vpop.xlane.xlu0 %1376  ;;  %2204 = vmatpush3.bf16.msra.mxu0 %v2401_v55 }
 0x19a   : > { %2469 = vpow2.f32 %v1386_v53  ;;  %v1214_v62 = vsub.f32 %v2848_v59, %v1210_v57  ;;  %v1382_v63 = vsub.f32 %v2844_v58, %v1377_v60  ;;  %v2402_v59 = vld [vmem:[%s2773_s25 + $0x28] sm:$0xff]   ;;  %2205 = vmatprep.subr.bf16.mxu0 %v2403_v6  ;;  %v798_v42 = vpop.f32.mrf.mxu0 }
 0x19b   : > { %v2917_v56 = vpop.eup %2457  ;;  %2471 = vpow2.f32 %v1219_v54  ;;  %2187 = vmatprep.subr.bf16.mxu1 %v2402_v59  ;;  %v2994_v43 = vadd.f32 %v798_v42, %v2980_v34 }
 0x19c   : > { %v2919_v2 = vpop.eup %2459  ;;  %v1221_v3 = vmul.f32 1.442695, %v1214_v62  ;;  %v1388_v4 = vmul.f32 1.442695, %v1382_v63  ;;  %889 = vadd.xlane.f32.xlu1 %v2917_v56  ;;  %2188 = vmatpush3.bf16.msra.mxu1 %v2402_v59 }
 0x19d   : > { %1058 = vadd.xlane.f32.xlu0 %v2919_v2  ;;  %v1379_v5 = vpop.xlane.xlu1 %1378  ;;  %2206 = vmatpush3.bf16.msra.mxu0 %v2403_v6 }
 0x19e   : > { %2473 = vpow2.f32 %v1221_v3  ;;  %v1383_v58 = vsub.f32 %v2852_v61, %v1379_v5  ;;  %v2404_v61 = vld [vmem:[%s2773_s25 + $0x20] sm:$0xff]   ;;  %2207 = vmatprep.subr.bf16.mxu0 %v2405_v10 }
 0x19f   : > { %v2926_v7 = vpop.eup %2461  ;;  %2475 = vpow2.f32 %v1388_v4  ;;  %2189 = vmatprep.subr.bf16.mxu1 %v2404_v61 }
 0x1a0   : > { %v2928_v8 = vpop.eup %2463  ;;  %v1390_v9 = vmul.f32 1.442695, %v1383_v58  ;;  %1060 = vadd.xlane.f32.xlu1 %v2926_v7  ;;  %2190 = vmatpush3.bf16.msra.mxu1 %v2404_v61 }
 0x1a1   : > { %1223 = vadd.xlane.f32.xlu0 %v2928_v8  ;;  %2208 = vmatpush3.bf16.msra.mxu0 %v2405_v10 }
 0x1a2   : > { %2477 = vpow2.f32 %v1390_v9  ;;  %2191 = vmatprep.subr.bf16.mxu1 %v2406_v13  ;;  %2209 = vmatprep.subr.bf16.mxu0 %v2407_v15 }
 0x1a3   : > { %v2934_v11 = vpop.eup %2465 }
 0x1a4   : > { %v2936_v12 = vpop.eup %2467  ;;  %1225 = vadd.xlane.f32.xlu1 %v2934_v11  ;;  %2192 = vmatpush3.bf16.msra.mxu1 %v2406_v13 }
 0x1a5   : > { %1392 = vadd.xlane.f32.xlu0 %v2936_v12  ;;  %2210 = vmatpush3.bf16.msra.mxu0 %v2407_v15 }
 0x1a6   : > { %2193 = vmatprep.subr.bf16.mxu1 %v2408_v19  ;;  %2211 = vmatprep.subr.bf16.mxu0 %v2409_v14 }
 0x1a7   : > { %v2942_v16 = vpop.eup %2469 }
 0x1a8   : > { %v2944_v17 = vpop.eup %2471  ;;  %1394 = vadd.xlane.f32.xlu1 %v2942_v16  ;;  %2194 = vmatpush3.bf16.msra.mxu1 %v2408_v19  ;;  %v2416_v19 = vld [vmem:[%s2773_s25 + $0xb0] sm:$0xff]  }
 0x1a9   : > { %1227 = vadd.xlane.f32.xlu0 %v2944_v17  ;;  %2212 = vmatpush3.bf16.msra.mxu0 %v2409_v14 }
 0x1aa   : > { %2195 = vmatprep.subr.bf16.mxu1 %v2410_v24  ;;  %2213 = vmatprep.subr.bf16.mxu0 %v2411_v25 }
 0x1ab   : > { %v2950_v22 = vpop.eup %2473 }
 0x1ac   : > { %v2952_v18 = vpop.eup %2475  ;;  %1229 = vadd.xlane.f32.xlu1 %v2950_v22  ;;  %2196 = vmatpush3.bf16.msra.mxu1 %v2410_v24 }
 0x1ad   : > { %1396 = vadd.xlane.f32.xlu0 %v2952_v18  ;;  %2214 = vmatpush3.bf16.msra.mxu0 %v2411_v25 }
 0x1ae   : > { %2197 = vmatprep.subr.bf16.mxu1 %v2412_v27  ;;  %2215 = vmatprep.subr.bf16.mxu0 %v2413_v28 }
 0x1af   : > { %v2958_v26 = vpop.eup %2477 }
 0x1b0   : > { %1398 = vadd.xlane.f32.xlu1 %v2958_v26  ;;  %2198 = vmatpush3.bf16.msra.mxu1 %v2412_v27  ;;  %v2418_v27 = vld [vmem:[%s2773_s25 + $0xa8] sm:$0xff]  }
 0x1b1   : > { %2216 = vmatpush3.bf16.msra.mxu0 %v2413_v28  ;;  %2223 = vmatprep.subr.bf16.mxu1 %v2965_v30 }
 0x1b2   : > { %2217 = vmatprep.subr.bf16.mxu0 %v2414_v29 }
 0x1b5   : > { %2218 = vmatpush3.bf16.msra.mxu0 %v2414_v29 }
 0x1b6   : > { %2243 = vmatprep.subr.bf16.mxu0 %v2969_v31 }
 0x219   : > { %v884_v45 = vpop.xlane.xlu0 %883 }
 0x21a   : > { %2479 = vrcp.f32 %v884_v45 }
 0x21d   : > { %v886_v23 = vpop.xlane.xlu1 %885  ;;  %v1055_v46 = vpop.xlane.xlu0 %1054 }
 0x21e   : > { %2481 = vrcp.f32 %v886_v23 }
 0x21f   : > { %2483 = vrcp.f32 %v1055_v46 }
 0x221   : > { %v1057_v47 = vpop.xlane.xlu1 %1056  ;;  %v888_v48 = vpop.xlane.xlu0 %887 }
 0x222   : > { %2485 = vrcp.f32 %v1057_v47  ;;  %v2423_v47 = vld [vmem:[%s2773_s25 + $0xe0] sm:$0xff]  }
 0x223   : > { %2487 = vrcp.f32 %v888_v48 }
 0x225   : > { %v890_v50 = vpop.xlane.xlu1 %889 }
 0x226   : > { %2489 = vrcp.f32 %v890_v50  ;;  %v1059_v51 = vpop.xlane.xlu0 %1058 }
 0x227   : > { %2491 = vrcp.f32 %v1059_v51  ;;  %v2480_v53 = vpop.eup %2479  ;;  %v2426_v51 = vld [vmem:[%s2773_s25 + $0x88] sm:$0xff]  }
 0x228   : > { %v895_v62 = vmul.f32 %v2480_v53, %v2894_v36  ;;  %v2427_v53 = vld [vmem:[%s2773_s25 + $0xd0] sm:$0xff]  }
 0x229   : > { %v1061_v54 = vpop.xlane.xlu1 %1060 }
 0x22a   : > { %2493 = vrcp.f32 %v1061_v54  ;;  %v1224_v57 = vpop.xlane.xlu0 %1223  ;;  %v2428_v54 = vld [vmem:[%s2773_s25 + $0x80] sm:$0xff]  }
 0x22b   : > { %v2482_v60 = vpop.eup %2481  ;;  %2495 = vrcp.f32 %v1224_v57  ;;  %v2429_v57 = vld [vmem:[%s2773_s25 + $0xc8] sm:$0xff]  }
 0x22c   : > { %v896_v63 = vmul.f32 %v2482_v60, %v2901_v44  ;;  %v2484_v1 = vpop.eup %2483 }
 0x22d   : > { %v1226_v55 = vpop.xlane.xlu1 %1225  ;;  %v1066_v58 = vmul.f32 %v2484_v1, %v2897_v41  ;;  %v2430_v1 = vld [vmem:[%s2773_s25 + $0xc0] sm:$0xff]  }
 0x22e   : > { %2497 = vrcp.f32 %v1226_v55  ;;  %v1393_v3 = vpop.xlane.xlu0 %1392  ;;  %v915_v4 = vpack.c.bf16 %v896_v63, %v895_v62 }
 0x22f   : > { %v2486_v5 = vpop.eup %2485  ;;  %2499 = vrcp.f32 %v1393_v3 }
 0x230   : > { %2199 = vmatprep.mubr.bf16.mxu1 %v915_v4  ;;  %v1067_v59 = vmul.f32 %v2486_v5, %v2905_v49  ;;  %v2488_v6 = vpop.eup %2487 }
 0x231   : > { %v1395_v9 = vpop.xlane.xlu1 %1394  ;;  %v897_v44 = vmul.f32 %v2488_v6, %v2909_v52  ;;  %v2419_v52 = vld [vmem:[%s2773_s25 + $0xf0] sm:$0xff]  }
 0x232   : > { %2501 = vrcp.f32 %v1395_v9  ;;  %v1086_v61 = vpack.c.bf16 %v1067_v59, %v1066_v58  ;;  %v1228_v23 = vpop.xlane.xlu0 %1227 }
 0x233   : > { %v2490_v36 = vpop.eup %2489 }
 0x234   : > { %2219 = vmatprep.mubr.bf16.mxu0 %v1086_v61  ;;  %v898_v10 = vmul.f32 %v2490_v36, %v2917_v56  ;;  %v2492_v13 = vpop.eup %2491 }
 0x235   : > { %v1068_v41 = vmul.f32 %v2492_v13, %v2919_v2  ;;  %v1230_v42 = vpop.xlane.xlu1 %1229 }
 0x236   : > { %v916_v15 = vpack.c.bf16 %v898_v10, %v897_v44  ;;  %2503 = vrcp.f32 %v1230_v42  ;;  %v1397_v50 = vpop.xlane.xlu0 %1396  ;;  %v705_v42 = vrot.slane %v2975_v32, %v471_v21 }
 0x237   : > { %v2494_v14 = vpop.eup %2493  ;;  %2505 = vrcp.f32 %v1228_v23 }
 0x238   : > { %2200 = vmatmul.mubr.bf16.vlgmr.msra.gmra.mxu1 %v916_v15  ;;  %v1069_v49 = vmul.f32 %v2494_v14, %v2926_v7  ;;  %v2496_v24 = vpop.eup %2495  ;;  %v2420_v7 = vld [vmem:[%s2773_s25 + $0xa0] sm:$0xff]  }
 0x239   : > { %2224 = vmatpush3.bf16.msra.mxu1 %v2965_v30  ;;  %v1235_v56 = vmul.f32 %v2496_v24, %v2928_v8  ;;  %v2421_v30 = vld [vmem:[%s2773_s25 + $0xe8] sm:$0xff]   ;;  %v1399_v48 = vpop.xlane.xlu1 %1398 }
 0x23a   : > { %2225 = vmatprep.subr.bf16.mxu1 %v2416_v19  ;;  %v1087_v25 = vpack.c.bf16 %v1069_v49, %v1068_v41  ;;  %2507 = vrcp.f32 %v1399_v48 }
 0x23b   : > { %v2498_v28 = vpop.eup %2497  ;;  %2509 = vrcp.f32 %v1397_v50 }
 0x23c   : > { %2220 = vmatmul.mubr.bf16.vlgmr.msra.gmra.mxu0 %v1087_v25  ;;  %v1236_v29 = vmul.f32 %v2498_v28, %v2934_v11  ;;  %v2500_v35 = vpop.eup %2499 }
 0x23d   : > { %2226 = vmatpush3.bf16.msra.mxu1 %v2416_v19  ;;  %2244 = vmatpush3.bf16.msra.mxu0 %v2969_v31  ;;  %v1404_v46 = vmul.f32 %v2500_v35, %v2936_v12  ;;  %v2422_v31 = vld [vmem:[%s2773_s25 + $0x98] sm:$0xff]   ;;  %v2424_v12 = vld [vmem:[%s2773_s25 + $0x90] sm:$0xff]  }
 0x23e   : > { %2227 = vmatprep.subr.bf16.mxu1 %v2418_v27  ;;  %2245 = vmatprep.subr.bf16.mxu0 %v2419_v52  ;;  %v1255_v2 = vpack.c.bf16 %v1236_v29, %v1235_v56 }
 0x23f   : > { %v2502_v45 = vpop.eup %2501 }
 0x240   : > { %2239 = vmatprep.mubr.bf16.mxu1 %v1255_v2  ;;  %v1405_v8 = vmul.f32 %v2502_v45, %v2942_v16  ;;  %v2425_v16 = vld [vmem:[%s2773_s25 + $0xd8] sm:$0xff]   ;;  %s2606_s25 = smov 64  }
 0x241   : > { %2228 = vmatpush3.bf16.msra.mxu1 %v2418_v27  ;;  %2246 = vmatpush3.bf16.msra.mxu0 %v2419_v52 }
 0x242   : > { %2229 = vmatprep.subr.bf16.mxu1 %v2420_v7  ;;  %2247 = vmatprep.subr.bf16.mxu0 %v2421_v30  ;;  %v1424_v11 = vpack.c.bf16 %v1405_v8, %v1404_v46  ;;  %v3045_v8 = vadd.f32 %v2982_v33, %v705_v42  ;;  %v3056_v33 = vadd.f32 %v2987_v38, %v705_v42 }
 0x243   : > { %v2504_v60 = vpop.eup %2503  ;;  %v3075_v38 = vadd.f32 %v2989_v39, %v2980_v34 }
 0x244   : > { %2259 = vmatprep.mubr.bf16.mxu0 %v1424_v11  ;;  %v2506_v62 = vpop.eup %2505  ;;  %v1238_v63 = vmul.f32 %v2504_v60, %v2950_v22  ;;  %v800_v22 = vpop.f32.mrf.mxu0  ;;  %v805_v11 = vmax.f32 %v3045_v8, 0.0  ;;  %v807_v50 = vmax.f32 %v3056_v33, 0.0 }
 0x245   : > { %2230 = vmatpush3.bf16.msra.mxu1 %v2420_v7  ;;  %2248 = vmatpush3.bf16.msra.mxu0 %v2421_v30  ;;  %v1237_v3 = vmul.f32 %v2506_v62, %v2944_v17 }
 0x246   : > { %2231 = vmatprep.subr.bf16.mxu1 %v2422_v31  ;;  %2249 = vmatprep.subr.bf16.mxu0 %v2423_v47  ;;  %v3029_v61 = vpop.f32.mrf.mxu0 }
 0x247   : > { %v2508_v55 = vpop.eup %2507  ;;  %v1256_v5 = vpack.c.bf16 %v1238_v63, %v1237_v3 }
 0x248   : > { %v2510_v4 = vpop.eup %2509  ;;  %v1407_v58 = vmul.f32 %v2508_v55, %v2958_v26 }
 0x249   : > { %2232 = vmatpush3.bf16.msra.mxu1 %v2422_v31  ;;  %2250 = vmatpush3.bf16.msra.mxu0 %v2423_v47  ;;  %v1406_v59 = vmul.f32 %v2510_v4, %v2952_v18  ;;  %v3052_v31 = vadd.f32 %v800_v22, %v705_v42  ;;  %v2440_v22 = vld [vmem:[%s3225_s8 + $0x10] sm:$0xff]  }
 0x24a   : > { %2233 = vmatprep.subr.bf16.mxu1 %v2424_v12  ;;  %2251 = vmatprep.subr.bf16.mxu0 %v2425_v16 }
 0x24b   : > { %v1425_v6 = vpack.c.bf16 %v1407_v58, %v1406_v59  ;;  %v811_v48 = vmax.f32 %v3052_v31, 0.0  ;;  %v2437_v58 = vld [vmem:[%s3224_s7 + $0x18] sm:$0xff]  }
 0x24c   : > { %v2438_v59 = vld [vmem:[%s3225_s8 + $0x18] sm:$0xff]  }
 0x24d   : > { %2234 = vmatpush3.bf16.msra.mxu1 %v2424_v12  ;;  %2252 = vmatpush3.bf16.msra.mxu0 %v2425_v16  ;;  %v3065_v12 = vadd.f32 %v2991_v40, %v705_v42  ;;  %v808_v40 = vmax.f32 %v3075_v38, 0.0 }
 0x24e   : > { %2235 = vmatprep.subr.bf16.mxu1 %v2426_v51  ;;  %2253 = vmatprep.subr.bf16.mxu0 %v2427_v53 }
 0x24f   : > { %v809_v16 = vmax.f32 %v3065_v12, 0.0 }
 0x251   : > { %2236 = vmatpush3.bf16.msra.mxu1 %v2426_v51  ;;  %2254 = vmatpush3.bf16.msra.mxu0 %v2427_v53 }
 0x252   : > { %2237 = vmatprep.subr.bf16.mxu1 %v2428_v54  ;;  %2255 = vmatprep.subr.bf16.mxu0 %v2429_v57 }
 0x255   : > { %2238 = vmatpush3.bf16.msra.mxu1 %v2428_v54  ;;  %2256 = vmatpush3.bf16.msra.mxu0 %v2429_v57 }
 0x256   : > { %2257 = vmatprep.subr.bf16.mxu0 %v2430_v1 }
 0x258   : > { %2240 = vmatmul.mubr.bf16.vlgmr.msra.gmra.mxu1 %v1256_v5  ;;  %v1541_v5 = vld [vmem:[%s3223_s6] sm:$0xf] }
 0x259   : > { %2258 = vmatpush3.bf16.msra.mxu0 %v2430_v1  ;;  %1602 = vmatprep.mubr.bf16.mxu1 %v2605_v0 }
 0x25a   : > { %2275 = vmatprep.subr.bf16.mxu0 %v2437_v58 }
 0x25c   : > { %2260 = vmatmul.mubr.bf16.vlgmr.msra.gmra.mxu0 %v1425_v6  ;;  %v2439_v6 = vld [vmem:[%s3224_s7 + $0x10] sm:$0xff]  }
 0x25d   : > { %2276 = vmatpush3.bf16.msra.mxu0 %v2437_v58 }
 0x25e   : > { %2277 = vmatprep.subr.bf16.mxu0 %v2439_v6 }
 0x261   : > { %2278 = vmatpush3.bf16.msra.mxu0 %v2439_v6 }
 0x2f8   : > { %v2201_v9 = vpop.f32.mrf.mxu1 }
 0x2fa   : > { %v999_v17 = vpop.f32.mrf.mxu1 }
 0x2fc   : > { %v2202_v36 = vpop.f32.mrf.mxu1  ;;  %v2221_v44 = vpop.f32.mrf.mxu0 }
 0x2fd   : > { %v1015_v10 = vpack.c.bf16 %v2202_v36, %v2201_v9  ;;  %v2107_v13 = vpack.c.bf16 %v2202_v36, %v2202_v36  ;;  %v2441_v9 = vld [vmem:[%s3224_s7 + $0x8] sm:$0xff]   ;;  %v2443_v36 = vld [vmem:[%s3224_s7] sm:$0xff]  }
 0x2fe   : > { %v1002_v15 = vpop.f32.mrf.mxu1  ;;  %v1170_v26 = vpop.f32.mrf.mxu0  ;;  %2279 = vmatprep.subr.bf16.mxu0 %v2441_v9 }
 0x2ff   : > { %1026 = vst.msk [vmem:[#allocation2 + $0x4] sm:$0xf] %vm1016_vm1, %v1015_v10  ;;  %v1014_v18 = vpack.c.bf16 %v1002_v15, %v999_v17  ;;  %v2106_v19 = vpack.c.bf16 %v1002_v15, %v1002_v15  ;;  %1030 = vrot.lane.b32.xlu1 %v2107_v13, %s2606_s25  ;;  %2280 = vmatpush3.bf16.msra.mxu0 %v2441_v9  ;;  %v2442_v17 = vld [vmem:[%s3225_s8 + $0x8] sm:$0xff]  }
 0x300   : > { %v2222_v0 = vpop.f32.mrf.mxu0  ;;  %2281 = vmatprep.subr.bf16.mxu0 %v2443_v36 }
 0x301   : > { %1017 = vst.msk [vmem:[#allocation2] sm:$0xf] %vm1016_vm1, %v1014_v18  ;;  %v1186_v14 = vpack.c.bf16 %v2222_v0, %v2221_v44  ;;  %1021 = vrot.lane.b32.xlu0 %v2106_v19, %s2606_s25  ;;  %v2109_v47 = vpack.c.bf16 %v2222_v0, %v2222_v0  ;;  %v2444_v44 = vld [vmem:[%s3225_s8] sm:$0xff]   ;;  %v806_v0 = vmax.f32 %v2985_v37, 0.0 }
 0x302   : > { %v1173_v41 = vpop.f32.mrf.mxu0 }
 0x303   : > { %1195 = vst.msk [vmem:[#allocation2 + $0xc] sm:$0xf] %vm1016_vm1, %v1186_v14  ;;  %v1185_v49 = vpack.c.bf16 %v1173_v41, %v1170_v26  ;;  %v2108_v20 = vpack.c.bf16 %v1173_v41, %v1173_v41  ;;  %2282 = vmatpush3.bf16.msra.mxu0 %v2443_v36  ;;  %v803_v26 = vadd.f32 %v3029_v61, %v2980_v34 }
 0x305   : > { %1187 = vst.msk [vmem:[#allocation2 + $0x8] sm:$0xf] %vm1016_vm1, %v1185_v49  ;;  %v812_v41 = vmax.f32 %v803_v26, 0.0  ;;  %v810_v49 = vmax.f32 %v2994_v43, 0.0 }
 0x318   : > { %v2241_v24 = vpop.f32.mrf.mxu1 }
 0x31a   : > { %v1339_v25 = vpop.f32.mrf.mxu1 }
 0x31c   : > { %v2242_v27 = vpop.f32.mrf.mxu1  ;;  %v2261_v52 = vpop.f32.mrf.mxu0 }
 0x31d   : > { %v1355_v28 = vpack.c.bf16 %v2242_v27, %v2241_v24  ;;  %v2111_v56 = vpack.c.bf16 %v2242_v27, %v2242_v27 }
 0x31e   : > { %v1342_v29 = vpop.f32.mrf.mxu1  ;;  %v1508_v35 = vpop.f32.mrf.mxu0 }
 0x31f   : > { %1364 = vst.msk [vmem:[#allocation2 + $0x14] sm:$0xf] %vm1016_vm1, %v1355_v28  ;;  %v1354_v2 = vpack.c.bf16 %v1342_v29, %v1339_v25  ;;  %v2110_v7 = vpack.c.bf16 %v1342_v29, %v1342_v29  ;;  %1368 = vrot.lane.b32.xlu1 %v2111_v56, %s2606_s25 }
 0x320   : > { %v2262_v30 = vpop.f32.mrf.mxu0 }
 0x321   : > { %1356 = vst.msk [vmem:[#allocation2 + $0x10] sm:$0xf] %vm1016_vm1, %v1354_v2  ;;  %v1524_v45 = vpack.c.bf16 %v2262_v30, %v2261_v52  ;;  %v2113_v23 = vpack.c.bf16 %v2262_v30, %v2262_v30  ;;  %1360 = vrot.lane.b32.xlu0 %v2110_v7, %s2606_s25 }
 0x322   : > { %v1511_v46 = vpop.f32.mrf.mxu0 }
 0x323   : > { %1533 = vst.msk [vmem:[#allocation2 + $0x1c] sm:$0xf] %vm1016_vm1, %v1524_v45  ;;  %v1523_v21 = vpack.c.bf16 %v1511_v46, %v1508_v35  ;;  %1537 = vrot.lane.b32.xlu1 %v2113_v23, %s2606_s25  ;;  %v2112_v32 = vpack.c.bf16 %v1511_v46, %v1511_v46 }
 0x325   : > { %1525 = vst.msk [vmem:[#allocation2 + $0x18] sm:$0xf] %vm1016_vm1, %v1523_v21  ;;  %1191 = vrot.lane.b32.xlu0 %v2108_v20, %s2606_s25 }
 0x327   : > { %1529 = vrot.lane.b32.xlu1 %v2112_v32, %s2606_s25 }
 0x329   : > { %817 = vrot.lane.b32.xlu0 %v805_v11, %s2606_s25 }
 0x32b   : > { %1199 = vrot.lane.b32.xlu1 %v2109_v47, %s2606_s25 }
 0x32d   : > { %823 = vrot.lane.b32.xlu0 %v811_v48, %s2606_s25 }
 0x32f   : > { %819 = vrot.lane.b32.xlu1 %v807_v50, %s2606_s25 }
 0x333   : > { %821 = vrot.lane.b32.xlu1 %v809_v16, %s2606_s25 }
 0x337   : > { %843 = vrot.lane.b32.xlu1 %v808_v40, %s2606_s25 }
 0x371   : > { %v1031_v51 = vpop.permute.xlu1 %1030 }
 0x372   : > { %1033 = vst.msk [vmem:[#allocation2 + $0x4] sm:$0xf] %vm1024_vm2, %v1031_v51 }
 0x373   : > { %v1022_v53 = vpop.permute.xlu0 %1021 }
 0x374   : > { %1025 = vst.msk [vmem:[#allocation2] sm:$0xf] %vm1024_vm2, %v1022_v53  ;;  %v2093_v53 = vld [vmem:[%s3226_s9] ss:$0 sm:$0xff] }
 0x391   : > { %v1369_v39 = vpop.permute.xlu1 %1368 }
 0x392   : > { %1371 = vst.msk [vmem:[#allocation2 + $0x14] sm:$0xf] %vm1024_vm2, %v1369_v39 }
 0x393   : > { %v1361_v54 = vpop.permute.xlu0 %1360 }
 0x394   : > { %1363 = vst.msk [vmem:[#allocation2 + $0x10] sm:$0xf] %vm1024_vm2, %v1361_v54 }
 0x395   : > { %v1538_v57 = vpop.permute.xlu1 %1537 }
 0x396   : > { %1540 = vst.msk [vmem:[#allocation2 + $0x1c] sm:$0xf] %vm1024_vm2, %v1538_v57 }
 0x397   : > { %v1192_v60 = vpop.permute.xlu0 %1191 }
 0x398   : > { %1194 = vst.msk [vmem:[#allocation2 + $0x8] sm:$0xf] %vm1024_vm2, %v1192_v60 }
 0x399   : > { %v1530_v62 = vpop.permute.xlu1 %1529 }
 0x39a   : > { %1532 = vst.msk [vmem:[#allocation2 + $0x18] sm:$0xf] %vm1024_vm2, %v1530_v62 }
 0x39b   : > { %v818_v61 = vpop.permute.xlu0 %817 }
 0x39c   : > { %v829_v52 = vadd.f32 %v818_v61, %v805_v11 }
 0x39d   : > { %v1200_v63 = vpop.permute.xlu1 %1199  ;;  %v2433_v55 = vld [vmem:[#allocation2 + $0x14] ss:$8 sps:$4 sm:$0xff]  }
 0x39e   : > { %1202 = vst.msk [vmem:[#allocation2 + $0xc] sm:$0xf] %vm1024_vm2, %v1200_v63  ;;  %1582 = vmatprep.subr.bf16.mxu1 %v2433_v55  ;;  %v833_v2 = vadd.f32 %v829_v52, %v806_v0 }
 0x39f   : > { %v2434_v3 = vld [vmem:[#allocation2] ss:$8 sps:$4 sm:$0xff]   ;;  %v824_v25 = vpop.permute.xlu0 %823 }
 0x3a0   : > { %v832_v56 = vadd.f32 %v824_v25, %v811_v48 }
 0x3a1   : > { %v2431_v1 = vld [vmem:[#allocation2 + $0x10] ss:$8 sps:$4 sm:$0xff]   ;;  %v820_v34 = vpop.permute.xlu1 %819 }
 0x3a2   : > { %1583 = vmatpush1.bf16.msra.mxu1 %v2431_v1  ;;  %v830_v37 = vadd.f32 %v820_v34, %v807_v50  ;;  %v836_v45 = vadd.f32 %v832_v56, %v812_v41 }
 0x3a4   : > { %v834_v43 = vadd.f32 %v830_v37, %v808_v40 }
 0x3a5   : > { %v2436_v4 = vld [vmem:[#allocation2 + $0x4] ss:$8 sps:$4 sm:$0xff]   ;;  %v822_v24 = vpop.permute.xlu1 %821 }
 0x3a6   : > { %1584 = vmatprep.subr.bf16.mxu1 %v2436_v4  ;;  %v831_v35 = vadd.f32 %v822_v24, %v809_v16 }
 0x3a7   : > { %1585 = vmatpush1.bf16.msra.mxu1 %v2434_v3 }
 0x3a8   : > { %2263 = vmatprep.subr.bf16.mxu1 %v2438_v59  ;;  %v835_v21 = vadd.f32 %v831_v35, %v810_v49 }
 0x3a9   : > { %v844_v27 = vpop.permute.xlu1 %843 }
 0x3aa   : > { %2076 = vmatmul.mubr.msk.bf16.vlgmr.msra.gmra.mxu1 %vm1566_vm3, %v1541_v5  ;;  %v854_v42 = vadd.f32 %v844_v27, %v834_v43 }
 0x3ab   : > { %2264 = vmatpush3.bf16.msra.mxu1 %v2438_v59 }
 0x3ac   : > { %2265 = vmatprep.subr.bf16.mxu1 %v2440_v22  ;;  %v858_v46 = vmul.f32 0.25, %v854_v42 }
 0x3af   : > { %2266 = vmatpush3.bf16.msra.mxu1 %v2440_v22 }
 0x3b0   : > { %2267 = vmatprep.subr.bf16.mxu1 %v2442_v17 }
 0x3b3   : > { %2268 = vmatpush3.bf16.msra.mxu1 %v2442_v17 }
 0x3b4   : > { %2269 = vmatprep.subr.bf16.mxu1 %v2444_v44 }
 0x3b7   : > { %2270 = vmatpush3.bf16.msra.mxu1 %v2444_v44 }
 0x46a   : > { %v1604_v10 = vpop.f32.mrf.mxu1 }
 0x46b   : > { %v1611_v13 = vpack.c.bf16 %v1604_v10, %v1604_v10 }
 0x46c   : > { %v1606_v15 = vpop.f32.mrf.mxu1 }
 0x46d   : > { %1613 = vst.msk [vmem:[#allocation3] sm:$0xf] %vm1016_vm1, %v1611_v13  ;;  %v1612_v18 = vpack.c.bf16 %v1606_v15, %v1606_v15  ;;  %1617 = vrot.lane.b32.xlu0 %v1611_v13, %s2606_s25 }
 0x46e   : > { %v1608_v19 = vpop.f32.mrf.mxu1 }
 0x46f   : > { %1621 = vst.msk [vmem:[#allocation3 + $0x8] sm:$0xf] %vm1016_vm1, %v1612_v18  ;;  %1625 = vrot.lane.b32.xlu1 %v1612_v18, %s2606_s25 }
 0x470   : > { %v1609_v14 = vpop.f32.mrf.mxu1 }
 0x471   : > { %841 = vrot.lane.b32.xlu0 %v806_v0, %s2606_s25 }
 0x473   : > { %847 = vrot.lane.b32.xlu1 %v812_v41, %s2606_s25 }
 0x475   : > { %845 = vrot.lane.b32.xlu0 %v810_v49, %s2606_s25 }
 0x4df   : > { %v1618_v28 = vpop.permute.xlu0 %1617 }
 0x4e0   : > { %1620 = vst.msk [vmem:[#allocation3 + $0x4] sm:$0xf] %vm1016_vm1, %v1618_v28 }
 0x4e1   : > { %v1626_v29 = vpop.permute.xlu1 %1625 }
 0x4e2   : > { %1628 = vst.msk [vmem:[#allocation3 + $0xc] sm:$0xf] %vm1016_vm1, %v1626_v29 }
 0x4e3   : > { %v842_v7 = vpop.permute.xlu0 %841 }
 0x4e4   : > { %v853_v30 = vadd.f32 %v842_v7, %v833_v2 }
 0x4e5   : > { %v848_v23 = vpop.permute.xlu1 %847 }
 0x4e6   : > { %v857_v8 = vmul.f32 0.25, %v853_v30  ;;  %v856_v20 = vadd.f32 %v848_v23, %v836_v45 }
 0x4e7   : > { %v846_v32 = vpop.permute.xlu0 %845  ;;  %v2445_v11 = vld [vmem:[#allocation3] sm:$0xff]  }
 0x4e8   : > { %v861_v31 = vpack.c.bf16 %v858_v46, %v857_v8  ;;  %v855_v33 = vadd.f32 %v846_v32, %v835_v21  ;;  %2283 = vmatprep.mubr.msk.bf16.mxu0 %vm579_vm0, %v2445_v11  ;;  %v860_v48 = vmul.f32 0.25, %v856_v20 }
 0x4e9   : > { %v2446_v47 = vld [vmem:[#allocation3 + $0x8] sm:$0xff]  }
 0x4ea   : > { %v859_v50 = vmul.f32 0.25, %v855_v33  ;;  %2271 = vmatprep.mubr.msk.bf16.mxu1 %vm579_vm0, %v861_v31  ;;  %2284 = vmatmul.mubr.msk.bf16.vlgmr.msra.gmra.mxu0 %vm579_vm0, %v2446_v47 }
 0x4ec   : > { %v862_v12 = vpack.c.bf16 %v860_v48, %v859_v50 }
 0x4ee   : > { %2272 = vmatmul.mubr.msk.bf16.vlgmr.msra.gmra.mxu1 %vm579_vm0, %v862_v12 }
 0x5aa   : > { %v2285_v38 = vpop.f32.mrf.mxu0 }
 0x5ac   : > { %v1802_v16 = vpop.f32.mrf.mxu0 }
 0x5ae   : > { %v2273_v40 = vpop.f32.mrf.mxu1  ;;  %v2286_v54 = vpop.f32.mrf.mxu0 }
 0x5af   : > { %v1811_v51 = vadd.f32 %v2285_v38, %v2273_v40 }
 0x5b0   : > { %v1713_v39 = vpop.f32.mrf.mxu1  ;;  %v1805_v1 = vpop.f32.mrf.mxu0 }
 0x5b1   : > { %v1803_v57 = vadd.f32 %v1802_v16, %v1713_v39  ;;  %v1826_v62 = vadd.f32 %v2093_v53, %v1811_v51 }
 0x5b2   : > { %v2274_v60 = vpop.f32.mrf.mxu1 }
 0x5b3   : > { %v1814_v63 = vadd.f32 %v2286_v54, %v2274_v60  ;;  %v1824_v3 = vadd.f32 %v2093_v53, %v1803_v57  ;;  %v1830_v58 = vmax.f32 %v1826_v62, 0.0 }
 0x5b4   : > { %v1716_v55 = vpop.f32.mrf.mxu1 }
 0x5b5   : > { %v1827_v4 = vadd.f32 %v2093_v53, %v1814_v63  ;;  %v1806_v5 = vadd.f32 %v1805_v1, %v1716_v55  ;;  %v1828_v22 = vmax.f32 %v1824_v3, 0.0 }
 0x5b7   : > { %v1831_v59 = vmax.f32 %v1827_v4, 0.0  ;;  %v1825_v6 = vadd.f32 %v2093_v53, %v1806_v5 }
 0x5b9   : > { %v2128_v9 = vpack.c.bf16 %v1831_v59, %v1830_v58  ;;  %v1829_v17 = vmax.f32 %v1825_v6, 0.0 }
 0x5bb   : > { %2130 = vst [vmem:[%s420_s24 + $0x8] sm:$0xff] %v2128_v9   ;;  %v2123_v36 = vpack.c.bf16 %v1829_v17, %v1828_v22 }
 0x5bd   : > { %2124 = vst [vmem:[%s420_s24] sm:$0xff] %v2123_v36  }
 0x5be   : > { %2524 = shalt.err (!%p2521_p7)
}
 0x5bf   : > { %s2525_s0 = scalar_lea.hbm %s3160_s12, 256  ;;  %s2529_s17 = scalar_lea.hbm %s3227_s10, 1024 }
 0x5c0   : > { %p2526_p9 = scmp.ne.s32.totalorder %s3160_s12, %s2525_s0  ;;  %p2530_p12 = scmp.lt.s32.totalorder %s3160_s12, %s3227_s10 }
 0x5c1   : > { %p2531_p13 = scmp.lt.s32.totalorder %s2529_s17, %s2525_s0 }
 0x5c2   : > { %p2527_p10 = pnand %p2526_p9, %p2715_p3 }
 0x5c3   : > { %p2532_p0 = por %p2531_p13, %p2530_p12 }
 0x5c4   : > { %p2528_p11 = pneg %p2527_p10 }
 0x5c6   : > { %p2533_p1 = pnand %p2532_p0, %p2528_p11 }
 0x5c8   : > { %2536 = shalt.err (!%p2533_p1)
}
 0x5c9   : > { %s2608_s28 = smov 4  }
 0x5ca   : > { %2287 = dma.vmem_to_hbm [thread:$0]  (%p2715_p3), %s3155_s16, 256, %s3160_s12, %s3164_s2, %s2606_s25, %s2606_s25, %s2608_s28  }
 0x5cb PF: > { %p2293_p2 = scmp.ge.s32.totalorder %s2603_s20, 2  ;;  %s1883_s21 = sand.u32 1, %s2575_s13  }
 0x5cc   : > { %s1884_s22 = scalar_lea.sflag [#allocation5], %s1883_s21 }
 0x5cd   : > { %p2290_p4 = pnand %p2293_p2, %p2724_p8 }
 0x5cf   : > { %p2291_p5 = pneg %p2290_p4 }
 0x5d1   : > { %2570 = dma.done.wait (%p2291_p5), %s1884_s22, 256  }
 0x5d2   : > { %2572 = vsyncadd (%p2291_p5), %s1884_s22, 4294967040  ;;  %s23_s20 = sadd.s32 1, %s2603_s20   ;;  %s3238_s26 = sld [smem:[#allocation7_spill]] }
 0x5d3   : > { %p20_p6 = scmp.ge.s32.totalorder %s23_s20, 6   ;;  %s3239_s13 = smov %s2579_s14 }
 0x5d4   : > { %s3240_s14 = smov %s2583_s15  ;;  %s3241_s15 = smov %s2733_s11 }
 0x5d5   : > { %s3242_s16 = smov %s2595_s18  ;;  %s3243_s17 = smov %s2599_s19 }
 0x5d6   : > { %s3244_s18 = smov %s3247_s23  ;;  %22 = sbr.rel (!%p20_p6) target bundleno = 9 (0x9), region = 104 }
 0x5d8   : > { %s3245_s19 = smov %s3238_s26 }
 0x5db   :  { %1889 = vsyncpa [#allocation5], 1 }
 0x5dc   :  { %1891 = vsyncpa [#allocation5 + $0x1], 1 }

</bundles_post_ra>
